<compile_context>
chip_gen: v7x
topology: tpu7x:2x2x1
jax: 0.10.0
libtpu: 0.0.40
codegen_flags: <defaults>
</compile_context>

<pallas_src>
import functools

import jax
import jax.numpy as jnp
from jax.experimental import pallas as pl
from jax.experimental.pallas import tpu as pltpu

FEAT_DIM = 256   # stand-in for resnet.fc.in_features (2048 in real ResNet-152)
EMBED = 32       # embed_size
BN_EPS = 1e-5    # PyTorch BatchNorm1d default eps


def _hw_tiling(hw, max_lanes=8192):
    """Pad HW up to a multiple of 256 (MXU width on v6e/v7x; also a 128-lane
    multiple for v5e), then pick the largest 256-multiple tile dividing the
    padded extent, capped at `max_lanes` to bound the per-step (F, t_hw) f32
    intermediate while amortizing the ~0.35 us/step grid overhead."""
    hw_pad = ((hw + 255) // 256) * 256
    n_blk = hw_pad // 256
    d = max(1, min(n_blk, max_lanes // 256))
    while n_blk % d:
        d -= 1
    t_hw = 256 * d
    return hw_pad, t_hw, n_blk // d


# ---------------------------------------------------------------------------
# Kernel 1: stand-in backbone stem + global average pool.
#   grid = (B, n_tiles)   B -> "parallel" (v7x: one TC per image subset),
#                         n_tiles -> "arbitrary" (GAP reduction).
#   x_ref  : (1, C, t_hw) bf16   one image's spatial tile, lane-dense on HW
#   w_ref  : (F, C)       bf16   channel-mix weight
#   b_ref  : (F, 1)       f32    bias
#   o_ref  : (1, F, 1)    f32    this image's pooled features
#   acc_ref: (F, 1)       f32    running spatial sum (per-core scratch)
# One (F, C) x (C, t_hw) MXU dot per step: K = C = 4 caps MXU depth (inherent
# to the stand-in), but N = t_hw is a multiple of 256, so the array width is
# fully used and push/drain overhead is amortized over one wide matmul.
# ---------------------------------------------------------------------------
def _stem_gap_kernel(x_ref, w_ref, b_ref, o_ref, acc_ref, *, hw, n_pad):
    k = pl.program_id(1)

    @pl.when(k == 0)
    def _init():
        acc_ref[...] = jnp.zeros_like(acc_ref)

    # dot -> bias -> ReLU -> lane-reduce, consumed immediately (single chain,
    # so the (F, t_hw) f32 intermediate never multiplies live ranges).
    z = jnp.dot(w_ref[...], x_ref[0], preferred_element_type=jnp.float32)
    z = jnp.maximum(z + b_ref[...], 0.0)                     # f32 VPU (v5e-safe)
    acc_ref[...] += jnp.sum(z, axis=1, keepdims=True)        # (F, 1) XLU reduce

    @pl.when(k == pl.num_programs(1) - 1)
    def _finalize():
        s = acc_ref[...]
        if n_pad:  # static: zero-padded lanes contributed ReLU(bias) each
            s = s - float(n_pad) * jnp.maximum(b_ref[...], 0.0)
        o_ref[0] = s * (1.0 / hw)                            # exact GAP


# ---------------------------------------------------------------------------
# Kernel 2 (tiny, single step): Linear + BatchNorm1d (train-mode batch stats).
#   feats_ref: (B, F) f32, w_ref: (F, E) bf16 (pre-transposed PyTorch weight),
#   b/gamma/beta: (1, E) f32, o_ref: (B, E) f32.
# ---------------------------------------------------------------------------
def _head_kernel(feats_ref, w_ref, b_ref, gamma_ref, beta_ref, o_ref):
    feats = feats_ref[...].astype(jnp.bfloat16)                       # (B, F)
    z = jnp.dot(feats, w_ref[...],
                preferred_element_type=jnp.float32) + b_ref[...]      # (B, E)
    # BatchNorm1d training mode: biased batch variance, eps = 1e-5.
    mean = jnp.mean(z, axis=0, keepdims=True)                         # (1, E)
    var = jnp.mean((z - mean) ** 2, axis=0, keepdims=True)
    z_hat = (z - mean) * jax.lax.rsqrt(var + BN_EPS)
    o_ref[...] = z_hat * gamma_ref[...] + beta_ref[...]


# ---------------------------------------------------------------------------
# Parameters / wrapper
# ---------------------------------------------------------------------------
def init_params(key, in_channels):
    """Matches EncoderCNN.init_weights() and layer defaults (stand-in stem)."""
    k_stem, k_lin = jax.random.split(key, 2)
    stem_w = jax.random.normal(k_stem, (FEAT_DIM, in_channels), jnp.float32) * 0.1
    # EncoderCNN.init_weights(): linear.weight ~ N(0, 0.02), bias = 0.
    lin_w = jax.random.normal(k_lin, (EMBED, FEAT_DIM), jnp.float32) * 0.02
    return {
        "stem_w": stem_w.astype(jnp.bfloat16),            # (F, C) bf16
        "stem_b": jnp.zeros((FEAT_DIM, 1), jnp.float32),
        "lin_w_t": lin_w.T.astype(jnp.bfloat16),          # (F, E) pre-transposed
        "lin_b": jnp.zeros((1, EMBED), jnp.float32),
        "bn_gamma": jnp.ones((1, EMBED), jnp.float32),    # BatchNorm1d defaults
        "bn_beta": jnp.zeros((1, EMBED), jnp.float32),
    }


@jax.jit
def encoder_cnn_forward(images, params):
    B, C, H, W = images.shape
    HW = H * W
    hw_pad, t_hw, n_tiles = _hw_tiling(HW)

    # Free metadata reshape; bf16 pre-cast halves HBM read; pad only if needed.
    x = images.reshape(B, C, HW).astype(jnp.bfloat16)
    if hw_pad != HW:
        x = jnp.pad(x, ((0, 0), (0, 0), (0, hw_pad - HW)))

    stem_flops = 2 * B * hw_pad * C * FEAT_DIM
    stem_bytes = (B * C * hw_pad * 2 + FEAT_DIM * C * 2 + FEAT_DIM * 4
                  + B * FEAT_DIM * 4)

    feats = pl.pallas_call(
        functools.partial(_stem_gap_kernel, hw=HW, n_pad=hw_pad - HW),
        out_shape=jax.ShapeDtypeStruct((B, FEAT_DIM, 1), jnp.float32),
        grid=(B, n_tiles),
        in_specs=[
            pl.BlockSpec((1, C, t_hw), lambda b, k: (b, 0, k)),      # image tile
            pl.BlockSpec((FEAT_DIM, C), lambda b, k: (0, 0)),        # stem W
            pl.BlockSpec((FEAT_DIM, 1), lambda b, k: (0, 0)),        # stem b
        ],
        out_specs=pl.BlockSpec((1, FEAT_DIM, 1), lambda b, k: (b, 0, 0)),
        scratch_shapes=[pltpu.VMEM((FEAT_DIM, 1), jnp.float32)],
        compiler_params=pltpu.CompilerParams(
            dimension_semantics=("parallel", "arbitrary")),
        cost_estimate=pl.CostEstimate(
            flops=stem_flops, transcendentals=0, bytes_accessed=stem_bytes),
    )(x, params["stem_w"], params["stem_b"])

    feats2d = feats.reshape(B, FEAT_DIM)            # free metadata reshape

    head_flops = 2 * B * FEAT_DIM * EMBED
    head_bytes = (B * FEAT_DIM * 4 + FEAT_DIM * EMBED * 2 + 3 * EMBED * 4
                  + B * EMBED * 4)

    out = pl.pallas_call(
        _head_kernel,
        out_shape=jax.ShapeDtypeStruct((B, EMBED), jnp.float32),
        grid=(1,),
        in_specs=[
            pl.BlockSpec((B, FEAT_DIM), lambda i: (0, 0)),
            pl.BlockSpec((FEAT_DIM, EMBED), lambda i: (0, 0)),
            pl.BlockSpec((1, EMBED), lambda i: (0, 0)),
            pl.BlockSpec((1, EMBED), lambda i: (0, 0)),
            pl.BlockSpec((1, EMBED), lambda i: (0, 0)),
        ],
        out_specs=pl.BlockSpec((B, EMBED), lambda i: (0, 0)),
        compiler_params=pltpu.CompilerParams(
            dimension_semantics=("arbitrary",)),
        cost_estimate=pl.CostEstimate(
            flops=head_flops, transcendentals=EMBED, bytes_accessed=head_bytes),
    )(feats2d, params["lin_w_t"], params["lin_b"],
      params["bn_gamma"], params["bn_beta"])

    return out


def _reference_forward(images, params):
    """Pure-JAX reference using the same bf16-matmul / f32-elementwise recipe."""
    B, C, H, W = images.shape
    x = images.reshape(B, C, H * W).astype(jnp.bfloat16)
    z = jnp.einsum("fc,bct->bft", params["stem_w"], x,
                   preferred_element_type=jnp.float32)
    z = jnp.maximum(z + params["stem_b"][None, :, :], 0.0)
    feats = jnp.mean(z, axis=2)                                        # (B, F)
    zl = jnp.dot(feats.astype(jnp.bfloat16), params["lin_w_t"],
                 preferred_element_type=jnp.float32) + params["lin_b"]  # (B, E)
    mean = jnp.mean(zl, axis=0, keepdims=True)
    var = jnp.mean((zl - mean) ** 2, axis=0, keepdims=True)
    z_hat = (zl - mean) * jax.lax.rsqrt(var + BN_EPS)
    return z_hat * params["bn_gamma"] + params["bn_beta"]


if __name__ == "__main__":
    key = jax.random.PRNGKey(0)
    k_img, k_par = jax.random.split(key)
    B, C, H, W = 2, 4, 16, 16           # NOTE: B >= 2 (train-mode BN needs it)
    images = jax.random.normal(k_img, (B, C, H, W), dtype=jnp.float32)
    params = init_params(k_par, C)

    out = jax.block_until_ready(encoder_cnn_forward(images, params))
    assert out.shape == (B, EMBED) and out.dtype == jnp.float32

    ref = _reference_forward(images, params)
    err = float(jnp.max(jnp.abs(out - ref)))
    assert jnp.allclose(out, ref, atol=1e-2, rtol=1e-2), f"max |diff| = {err}"
    print("KERNEL_OK")
</pallas_src>

<mosaic_0001>
module attributes {stable_mosaic.version = 11 : i64} {
  func.func @_stem_gap_kernel(%arg0: i32, %arg1: i32, %arg2: memref<1x4x256xbf16, #tpu.memory_space<vmem>>, %arg3: memref<256x4xbf16, #tpu.memory_space<vmem>>, %arg4: memref<256x1xf32, #tpu.memory_space<vmem>>, %arg5: memref<1x256x1xf32, #tpu.memory_space<vmem>>, %arg6: memref<256x1xf32, #tpu.memory_space<vmem>>) attributes {dimension_semantics = [#tpu.dimension_semantics<parallel>, #tpu.dimension_semantics<arbitrary>], iteration_bounds = array<i64: 2, 1>, scalar_prefetch = 0 : i64, scratch_operands = 1 : i64, tpu.core_type = #tpu.core_type<tc>, window_params = [{transform_indices = @transform_0, window_bounds = array<i64: 1, 4, 256>}, {pipeline_mode = #tpu.pipeline_mode<synchronous>, transform_indices = @transform_1, window_bounds = array<i64: 256, 4>}, {pipeline_mode = #tpu.pipeline_mode<synchronous>, transform_indices = @transform_2, window_bounds = array<i64: 256, 1>}, {transform_indices = @transform_3, window_bounds = array<i64: 1, 256, 1>}]} {
    %c0_i32 = arith.constant 0 : i32
    %0 = arith.cmpi eq, %arg1, %c0_i32 : i32
    %1 = arith.extui %0 : i1 to i32
    %c0_i32_0 = arith.constant 0 : i32
    %2 = arith.cmpi ne, %1, %c0_i32_0 : i32
    scf.if %2 {
      %cst_15 = arith.constant 0.000000e+00 : f32
      %20 = vector.broadcast %cst_15 : f32 to vector<256x1xf32>
      %c0_16 = arith.constant 0 : index
      %c0_17 = arith.constant 0 : index
      %21 = vector.load %arg6[%c0_16, %c0_17] : memref<256x1xf32, #tpu.memory_space<vmem>>, vector<256x1xf32>
      tpu.vector_store %arg6[%c0_16, %c0_17], %20 {strides = array<i32>} : memref<256x1xf32, #tpu.memory_space<vmem>>, vector<256x1xf32>,
    } else {
    }
    %c0 = arith.constant 0 : index
    %c0_1 = arith.constant 0 : index
    %3 = vector.load %arg3[%c0, %c0_1] : memref<256x4xbf16, #tpu.memory_space<vmem>>, vector<256x4xbf16>
    %c0_2 = arith.constant 0 : index
    %c0_3 = arith.constant 0 : index
    %c0_4 = arith.constant 0 : index
    %4 = vector.load %arg2[%c0_2, %c0_3, %c0_4] : memref<1x4x256xbf16, #tpu.memory_space<vmem>>, vector<1x4x256xbf16>
    %5 = vector.shape_cast %4 : vector<1x4x256xbf16> to vector<4x256xbf16>
    %cst = arith.constant dense<0.000000e+00> : vector<256x256xf32>
    %6 = tpu.matmul %3, %5, %cst {dimension_numbers = #tpu.dot_dimension_numbers<[1], [0], [0], [1], [0, 0, 1, 1], [], []>} : vector<256x4xbf16>, vector<4x256xbf16>, vector<256x256xf32> -> vector<256x256xf32>
    %c0_5 = arith.constant 0 : index
    %c0_6 = arith.constant 0 : index
    %7 = vector.load %arg4[%c0_5, %c0_6] : memref<256x1xf32, #tpu.memory_space<vmem>>, vector<256x1xf32>
    %8 = vector.broadcast %7 : vector<256x1xf32> to vector<256x256xf32>
    %9 = arith.addf %6, %8 : vector<256x256xf32>
    %cst_7 = arith.constant 0.000000e+00 : f32
    %10 = vector.broadcast %cst_7 : f32 to vector<256x256xf32>
    %11 = arith.maximumf %9, %10 : vector<256x256xf32>
    %c0_8 = arith.constant 0 : index
    %c0_9 = arith.constant 0 : index
    %12 = vector.load %arg6[%c0_8, %c0_9] : memref<256x1xf32, #tpu.memory_space<vmem>>, vector<256x1xf32>
    %cst_10 = arith.constant dense<0.000000e+00> : vector<256xf32>
    %13 = vector.multi_reduction <add>, %11, %cst_10 [1] : vector<256x256xf32> to vector<256xf32>
    %14 = vector.shape_cast %13 : vector<256xf32> to vector<256x1xf32>
    %15 = arith.addf %12, %14 : vector<256x1xf32>
    %c0_11 = arith.constant 0 : index
    %c0_12 = arith.constant 0 : index
    %16 = vector.load %arg6[%c0_11, %c0_12] : memref<256x1xf32, #tpu.memory_space<vmem>>, vector<256x1xf32>
    tpu.vector_store %arg6[%c0_11, %c0_12], %15 {strides = array<i32>} : memref<256x1xf32, #tpu.memory_space<vmem>>, vector<256x1xf32>,
    %c0_i32_13 = arith.constant 0 : i32
    %17 = arith.cmpi eq, %arg1, %c0_i32_13 : i32
    %18 = arith.extui %17 : i1 to i32
    %c0_i32_14 = arith.constant 0 : i32
    %19 = arith.cmpi ne, %18, %c0_i32_14 : i32
    scf.if %19 {
      %c0_15 = arith.constant 0 : index
      %c0_16 = arith.constant 0 : index
      %20 = vector.load %arg6[%c0_15, %c0_16] : memref<256x1xf32, #tpu.memory_space<vmem>>, vector<256x1xf32>
      %cst_17 = arith.constant 3.906250e-03 : f32
      %21 = vector.broadcast %cst_17 : f32 to vector<256x1xf32>
      %22 = arith.mulf %20, %21 : vector<256x1xf32>
      %c0_18 = arith.constant 0 : index
      %c0_19 = arith.constant 0 : index
      %c0_20 = arith.constant 0 : index
      %23 = vector.load %arg5[%c0_18, %c0_19, %c0_20] : memref<1x256x1xf32, #tpu.memory_space<vmem>>, vector<1x256x1xf32>
      %24 = vector.shape_cast %23 : vector<1x256x1xf32> to vector<256x1xf32>
      %25 = vector.shape_cast %22 : vector<256x1xf32> to vector<1x256x1xf32>
      tpu.vector_store %arg5[%c0_18, %c0_19, %c0_20], %25 {strides = array<i32>} : memref<1x256x1xf32, #tpu.memory_space<vmem>>, vector<1x256x1xf32>,
    } else {
    }
    return
  }
  func.func @transform_0(%arg0: i32, %arg1: i32) -> (i32, i32, i32) {
    %c0_i32 = arith.constant 0 : i32
    %c0_i32_0 = arith.constant 0 : i32
    return %arg0, %c0_i32, %arg1 : i32, i32, i32
  }
  func.func @transform_1(%arg0: i32, %arg1: i32) -> (i32, i32) {
    %c0_i32 = arith.constant 0 : i32
    %c0_i32_0 = arith.constant 0 : i32
    %c0_i32_1 = arith.constant 0 : i32
    return %c0_i32, %c0_i32_0 : i32, i32
  }
  func.func @transform_2(%arg0: i32, %arg1: i32) -> (i32, i32) {
    %c0_i32 = arith.constant 0 : i32
    %c0_i32_0 = arith.constant 0 : i32
    %c0_i32_1 = arith.constant 0 : i32
    return %c0_i32, %c0_i32_0 : i32, i32
  }
  func.func @transform_3(%arg0: i32, %arg1: i32) -> (i32, i32, i32) {
    %c0_i32 = arith.constant 0 : i32
    %c0_i32_0 = arith.constant 0 : i32
    %c0_i32_1 = arith.constant 0 : i32
    return %arg0, %c0_i32, %c0_i32_0 : i32, i32, i32
  }
}

module attributes {stable_mosaic.version = 11 : i64} {
  func.func @_head_kernel(%arg0: i32, %arg1: memref<2x256xf32, #tpu.memory_space<vmem>>, %arg2: memref<256x32xbf16, #tpu.memory_space<vmem>>, %arg3: memref<1x32xf32, #tpu.memory_space<vmem>>, %arg4: memref<1x32xf32, #tpu.memory_space<vmem>>, %arg5: memref<1x32xf32, #tpu.memory_space<vmem>>, %arg6: memref<2x32xf32, #tpu.memory_space<vmem>>) attributes {dimension_semantics = [#tpu.dimension_semantics<arbitrary>], iteration_bounds = array<i64: 1>, scalar_prefetch = 0 : i64, scratch_operands = 0 : i64, tpu.core_type = #tpu.core_type<tc>, window_params = [{pipeline_mode = #tpu.pipeline_mode<synchronous>, transform_indices = @transform_0, window_bounds = array<i64: 2, 256>}, {pipeline_mode = #tpu.pipeline_mode<synchronous>, transform_indices = @transform_1, window_bounds = array<i64: 256, 32>}, {pipeline_mode = #tpu.pipeline_mode<synchronous>, transform_indices = @transform_2, window_bounds = array<i64: 1, 32>}, {pipeline_mode = #tpu.pipeline_mode<synchronous>, transform_indices = @transform_3, window_bounds = array<i64: 1, 32>}, {pipeline_mode = #tpu.pipeline_mode<synchronous>, transform_indices = @transform_4, window_bounds = array<i64: 1, 32>}, {pipeline_mode = #tpu.pipeline_mode<synchronous>, transform_indices = @transform_5, window_bounds = array<i64: 2, 32>}]} {
    %c0 = arith.constant 0 : index
    %c0_0 = arith.constant 0 : index
    %0 = vector.load %arg1[%c0, %c0_0] : memref<2x256xf32, #tpu.memory_space<vmem>>, vector<2x256xf32>
    %1 = arith.truncf %0 : vector<2x256xf32> to vector<2x256xbf16>
    %c0_1 = arith.constant 0 : index
    %c0_2 = arith.constant 0 : index
    %2 = vector.load %arg2[%c0_1, %c0_2] : memref<256x32xbf16, #tpu.memory_space<vmem>>, vector<256x32xbf16>
    %cst = arith.constant dense<0.000000e+00> : vector<2x32xf32>
    %3 = tpu.matmul %1, %2, %cst {dimension_numbers = #tpu.dot_dimension_numbers<[1], [0], [0], [1], [0, 0, 1, 1], [], []>} : vector<2x256xbf16>, vector<256x32xbf16>, vector<2x32xf32> -> vector<2x32xf32>
    %c0_3 = arith.constant 0 : index
    %c0_4 = arith.constant 0 : index
    %4 = vector.load %arg3[%c0_3, %c0_4] : memref<1x32xf32, #tpu.memory_space<vmem>>, vector<1x32xf32>
    %5 = vector.broadcast %4 : vector<1x32xf32> to vector<2x32xf32>
    %6 = arith.addf %3, %5 : vector<2x32xf32>
    %cst_5 = arith.constant dense<0.000000e+00> : vector<32xf32>
    %7 = vector.multi_reduction <add>, %6, %cst_5 [0] : vector<2x32xf32> to vector<32xf32>
    %8 = vector.shape_cast %7 : vector<32xf32> to vector<1x32xf32>
    %cst_6 = arith.constant 2.000000e+00 : f32
    %9 = vector.broadcast %cst_6 : f32 to vector<1x32xf32>
    %10 = arith.divf %8, %9 : vector<1x32xf32>
    %11 = vector.broadcast %10 : vector<1x32xf32> to vector<2x32xf32>
    %12 = arith.subf %6, %11 : vector<2x32xf32>
    %13 = arith.mulf %12, %12 : vector<2x32xf32>
    %cst_7 = arith.constant dense<0.000000e+00> : vector<32xf32>
    %14 = vector.multi_reduction <add>, %13, %cst_7 [0] : vector<2x32xf32> to vector<32xf32>
    %15 = vector.shape_cast %14 : vector<32xf32> to vector<1x32xf32>
    %cst_8 = arith.constant 2.000000e+00 : f32
    %16 = vector.broadcast %cst_8 : f32 to vector<1x32xf32>
    %17 = arith.divf %15, %16 : vector<1x32xf32>
    %18 = vector.broadcast %10 : vector<1x32xf32> to vector<2x32xf32>
    %19 = arith.subf %6, %18 : vector<2x32xf32>
    %cst_9 = arith.constant 9.99999974E-6 : f32
    %20 = vector.broadcast %cst_9 : f32 to vector<1x32xf32>
    %21 = arith.addf %17, %20 : vector<1x32xf32>
    %22 = math.rsqrt %21 : vector<1x32xf32>
    %23 = vector.broadcast %22 : vector<1x32xf32> to vector<2x32xf32>
    %24 = arith.mulf %19, %23 : vector<2x32xf32>
    %c0_10 = arith.constant 0 : index
    %c0_11 = arith.constant 0 : index
    %25 = vector.load %arg4[%c0_10, %c0_11] : memref<1x32xf32, #tpu.memory_space<vmem>>, vector<1x32xf32>
    %26 = vector.broadcast %25 : vector<1x32xf32> to vector<2x32xf32>
    %27 = arith.mulf %24, %26 : vector<2x32xf32>
    %c0_12 = arith.constant 0 : index
    %c0_13 = arith.constant 0 : index
    %28 = vector.load %arg5[%c0_12, %c0_13] : memref<1x32xf32, #tpu.memory_space<vmem>>, vector<1x32xf32>
    %29 = vector.broadcast %28 : vector<1x32xf32> to vector<2x32xf32>
    %30 = arith.addf %27, %29 : vector<2x32xf32>
    %c0_14 = arith.constant 0 : index
    %c0_15 = arith.constant 0 : index
    %31 = vector.load %arg6[%c0_14, %c0_15] : memref<2x32xf32, #tpu.memory_space<vmem>>, vector<2x32xf32>
    tpu.vector_store %arg6[%c0_14, %c0_15], %30 {strides = array<i32>} : memref<2x32xf32, #tpu.memory_space<vmem>>, vector<2x32xf32>,
    return
  }
  func.func @transform_0(%arg0: i32) -> (i32, i32) {
    %c0_i32 = arith.constant 0 : i32
    %c0_i32_0 = arith.constant 0 : i32
    %c0_i32_1 = arith.constant 0 : i32
    return %c0_i32, %c0_i32_0 : i32, i32
  }
  func.func @transform_1(%arg0: i32) -> (i32, i32) {
    %c0_i32 = arith.constant 0 : i32
    %c0_i32_0 = arith.constant 0 : i32
    %c0_i32_1 = arith.constant 0 : i32
    return %c0_i32, %c0_i32_0 : i32, i32
  }
  func.func @transform_2(%arg0: i32) -> (i32, i32) {
    %c0_i32 = arith.constant 0 : i32
    %c0_i32_0 = arith.constant 0 : i32
    %c0_i32_1 = arith.constant 0 : i32
    return %c0_i32, %c0_i32_0 : i32, i32
  }
  func.func @transform_3(%arg0: i32) -> (i32, i32) {
    %c0_i32 = arith.constant 0 : i32
    %c0_i32_0 = arith.constant 0 : i32
    %c0_i32_1 = arith.constant 0 : i32
    return %c0_i32, %c0_i32_0 : i32, i32
  }
  func.func @transform_4(%arg0: i32) -> (i32, i32) {
    %c0_i32 = arith.constant 0 : i32
    %c0_i32_0 = arith.constant 0 : i32
    %c0_i32_1 = arith.constant 0 : i32
    return %c0_i32, %c0_i32_0 : i32, i32
  }
  func.func @transform_5(%arg0: i32) -> (i32, i32) {
    %c0_i32 = arith.constant 0 : i32
    %c0_i32_0 = arith.constant 0 : i32
    %c0_i32_1 = arith.constant 0 : i32
    return %c0_i32, %c0_i32_0 : i32, i32
  }
}

</mosaic_0001>

<bundles_post_ra>
// kernel: encoder_cnn_forward.3
= control target key start
LH: loop header
LB: loop body
LE: loop exit
PB: predicated region body
PF: predicated region fallthrough
CT: control target
= control target key end

     0   :  { %s456_s0 = inlined_call_operand.vmem [shape: f32[2,256], index: 0, kind: input, shape index: {}]   ;;  %s457_s1 = inlined_call_operand.vmem [shape: bf16[256,32], index: 1, kind: input, shape index: {}]   ;;  %s458_s2 = inlined_call_operand.vmem [shape: f32[1,32], index: 2, kind: input, shape index: {}]   ;;  %s459_s3 = inlined_call_operand.vmem [shape: f32[1,32], index: 3, kind: input, shape index: {}]   ;;  %s460_s4 = inlined_call_operand.vmem [shape: f32[1,32], index: 4, kind: input, shape index: {}]   ;;  %s461_s5 = inlined_call_operand.hbm [shape: f32[2,32], index: 5, kind: output, shape index: {}]  }
   0x1   :  { %v308_v0 = vld [vmem:[%s457_s1 + $0x40] sm:$0xff]   ;;  %v310_v2 = vld [vmem:[%s457_s1 + $0x48] sm:$0xff]   ;;  %v312_v4 = vld [vmem:[%s457_s1 + $0x50] sm:$0xff]  }
   0x2   :  { %v309_v1 = vld [vmem:[%s457_s1] sm:$0xff]   ;;  %285 = vmatprep.subr.bf16.mxu0 %v308_v0  ;;  %v311_v3 = vld [vmem:[%s457_s1 + $0x8] sm:$0xff]   ;;  %v313_v5 = vld [vmem:[%s457_s1 + $0x10] sm:$0xff]  }
   0x3   :  { %286 = vmatpush3.bf16.msra.mxu0 %v309_v1  ;;  %v314_v6 = vld [vmem:[%s457_s1 + $0x58] sm:$0xff]   ;;  %v316_v8 = vld [vmem:[%s457_s1 + $0x60] sm:$0xff]   ;;  %v318_v10 = vld [vmem:[%s457_s1 + $0x68] sm:$0xff]  }
   0x4   :  { %287 = vmatprep.subr.bf16.mxu0 %v310_v2  ;;  %v315_v7 = vld [vmem:[%s457_s1 + $0x18] sm:$0xff]   ;;  %v317_v9 = vld [vmem:[%s457_s1 + $0x20] sm:$0xff]  }
   0x5   :  { %v265_v11 = vld.sshfl [vmem:[%s456_s0] sm:$0x33 pattern:$0x76325410] }
   0x7   :  { %288 = vmatpush3.bf16.msra.mxu0 %v311_v3 }
   0x8   :  { %289 = vmatprep.subr.bf16.mxu0 %v312_v4 }
   0xb   :  { %290 = vmatpush3.bf16.msra.mxu0 %v313_v5 }
   0xc   :  { %291 = vmatprep.subr.bf16.mxu0 %v314_v6 }
   0xf   :  { %292 = vmatpush3.bf16.msra.mxu0 %v315_v7 }
  0x10   :  { %293 = vmatprep.subr.bf16.mxu0 %v316_v8 }
  0x11   :  { %10 = vsyncpa [#allocation3], 0  ;;  %v31_v12 = vcombine.high %v265_v11, %v265_v11  ;;  %v319_v13 = vld [vmem:[%s457_s1 + $0x28] sm:$0xff]   ;;  %v320_v15 = vld [vmem:[%s457_s1 + $0x70] sm:$0xff]   ;;  %v34_v19 = vpack.c.bf16 %v265_v11, %v265_v11  ;;  %vm211_vm0 = vcmask 254976   ;;  %s350_s30 = smov [#allocation2]  }
  0x12   :  { %v321_v16 = vld [vmem:[%s457_s1 + $0x30] sm:$0xff]   ;;  %v322_v17 = vld [vmem:[%s457_s1 + $0x78] sm:$0xff]   ;;  %v266_v21 = vld [vmem:[%s458_s2] ss:$0 sm:$0xff]  ;;  %s257_s6 = sshll.u32 %s350_s30, 4  ;;  %s258_s6 = int_to_ptr.vmem [resolvable:$true] %s257_s6 }
  0x13   :  { %294 = vmatpush3.bf16.msra.mxu0 %v317_v9  ;;  %v35_v14 = vpack.c.bf16 %v31_v12, %v31_v12  ;;  %v323_v18 = vld [vmem:[%s457_s1 + $0x38] sm:$0xff]   ;;  %v283_v47 = vld [vmem:[%s459_s3] ss:$0 sm:$0xff]  ;;  %s326_s7 = scalar_lea.vmem %s258_s6, 32  ;;  %p331_p1 = scmp.lt.s32.totalorder %s258_s6, %s258_s6 }
  0x14   :  { %295 = vmatprep.subr.bf16.mxu0 %v318_v10  ;;  %v284_v49 = vld [vmem:[%s460_s4] ss:$0 sm:$0xff]  ;;  %p327_p0 = scmp.ne.s32.totalorder %s258_s6, %s326_s7  ;;  %p332_p2 = scmp.lt.s32.totalorder %s326_s7, %s326_s7 }
  0x15   :  { %203 = vmatprep.mubr.bf16.mxu0 %v35_v14 }
  0x16   :  { %p333_p3 = por %p332_p2, %p331_p1 }
  0x17   :  { %296 = vmatpush3.bf16.msra.mxu0 %v319_v13 }
  0x18   :  { %297 = vmatprep.subr.bf16.mxu0 %v320_v15  ;;  %p334_p4 = pnand %p333_p3, %p327_p0 }
  0x1b   :  { %298 = vmatpush3.bf16.msra.mxu0 %v321_v16 }
  0x1c   :  { %299 = vmatprep.subr.bf16.mxu0 %v322_v17 }
  0x1f   :  { %300 = vmatpush3.bf16.msra.mxu0 %v323_v18 }
  0x22   :  { %204 = vmatmul.mubr.bf16.vlgmr.msra.gmra.mrb[0].mxu0 %v34_v19 }
  0xf5   :  { %v301_v20 = vpop.f32.mrb[0].mxu0 }
  0xf6   :  { %v302_v22 = vpop.f32.mrb[1].mxu0 }
  0xf7   :  { %v303_v23 = vadd.f32 %v302_v22, %v301_v20  ;;  %v304_v24 = vpop.f32.mrb[2].mxu0 }
  0xf8   :  { %v305_v25 = vpop.f32.mrb[3].mxu0 }
  0xf9   :  { %v206_v26 = vadd.f32 %v303_v23, %v266_v21 }
  0xfb   :  { %v212_v27 = vsel %vm211_vm0, %v206_v26, 0.0 }
  0xfc   :  { %v213_v28 = vrot.slane %v212_v27, 4 }
  0xfe   :  { %v214_v29 = vadd.f32 %v213_v28, %v212_v27 }
 0x100   :  { %v215_v30 = vrot.slane %v214_v29, 2 }
 0x102   :  { %v216_v31 = vadd.f32 %v215_v30, %v214_v29 }
 0x104   :  { %v217_v32 = vrot.slane %v216_v31, 1 }
 0x106   :  { %v218_v33 = vadd.f32 %v217_v32, %v216_v31 }
 0x108   :  { %v220_v34 = vmul.f32 0.5, %v218_v33 }
 0x10a   :  { %v221_v35 = vsub.f32 %v206_v26, %v220_v34 }
 0x10c   :  { %v222_v36 = vmul.f32 %v221_v35, %v221_v35 }
 0x10e   :  { %v223_v37 = vsel %vm211_vm0, %v222_v36, 0.0 }
 0x10f   :  { %v224_v38 = vrot.slane %v223_v37, 4 }
 0x111   :  { %v225_v39 = vadd.f32 %v224_v38, %v223_v37 }
 0x113   :  { %v226_v40 = vrot.slane %v225_v39, 2 }
 0x115   :  { %v227_v41 = vadd.f32 %v226_v40, %v225_v39 }
 0x117   :  { %v228_v42 = vrot.slane %v227_v41, 1 }
 0x119   :  { %v229_v43 = vadd.f32 %v228_v42, %v227_v41 }
 0x11b   :  { %v230_v44 = vmul.f32 0.5, %v229_v43 }
 0x11d   :  { %v231_v45 = vadd.f32 1e-05, %v230_v44 }
 0x11f   :  { %324 = vrsqrt.f32 %v231_v45 }
 0x129   :  { %v325_v46 = vpop.eup %324 }
 0x12a   :  { %v233_v48 = vmul.f32 %v325_v46, %v221_v35 }
 0x12c   :  { %v241_v50 = vmul.f32 %v283_v47, %v233_v48 }
 0x12e   :  { %v249_v51 = vadd.f32 %v284_v49, %v241_v50 }
 0x130   :  { %250 = vst.msk [vmem:[#allocation2] sm:$0x3] %vm211_vm0, %v249_v51 }
 0x131   :  { %337 = shalt.err (!%p334_p4)
}
 0x132   :  { %s338_s9 = scalar_lea.hbm %s461_s5, 32 }
 0x133   :  { %p339_p5 = scmp.ne.s32.totalorder %s461_s5, %s338_s9  ;;  %p342_p6 = scmp.lt.u32.totalorder %s338_s9, %s461_s5 }
 0x135   :  { %p344_p7 = pnand %p342_p6, %p339_p5 }
 0x137   :  { %347 = shalt.err (!%p344_p7)
}
 0x138   :  { %260 = dma.vmem_to_hbm [thread:$0]  %s258_s6, 32, %s461_s5, [#allocation3]  }
 0x139   :  { %348 = dma.done.wait [#allocation3], 32  }
 0x13a   :  { %349 = vsyncadd [#allocation3], 4294967264 }
 0x13b   :  { %264 = vsyncpa [#allocation3], 1 }

// kernel: encoder_cnn_forward.2
= control target key start
LH: loop header
LB: loop body
LE: loop exit
PB: predicated region body
PF: predicated region fallthrough
CT: control target
= control target key end

     0   :  { %s1364_s12 = smov 0   ;;  %s1366_s13 = smov 0   ;;  %s1761_s0 = inlined_call_operand.vmem [shape: bf16[2,4,256], index: 0, kind: input, shape index: {}]   ;;  %s1762_s1 = inlined_call_operand.vmem [shape: bf16[256,4], index: 1, kind: input, shape index: {}]   ;;  %s1763_s2 = inlined_call_operand.vmem [shape: f32[256,1], index: 2, kind: input, shape index: {}]   ;;  %s1764_s3 = inlined_call_operand.vmem [shape: f32[2,256,1], index: 3, kind: output, shape index: {}]  }
   0x1   :  { %s1368_s14 = smov 0  }
   0x2 LB: > { %s25_s15 = sadd.s32 1, %s1336_s13  ;;  %p1229_p0 = scmp.ge.s32.totalorder %s1340_s14, 1  ;;  %s1340_s14 = sphi %s1368_s14, %s13_s14   ;;  %s1336_s13 = sphi %s1366_s13, %s1766_s13   ;;  %s1332_s12 = sphi %s1364_s12, %s1765_s12  }
   0x3   : > { %p27_p1 = scmp.ge.s32.totalorder %s25_s15, 2  ;;  %p156_p2 = scmp.lt.s32.totalorder %s1340_s14, 3 }
   0x5   : > { %s1768_s15 = smov (%p27_p1, %s25_s15), 0  ;;  %p157_p3 = pnand %p1229_p0, %p156_p2 }
   0x6   : > { %p185_p4 = scmp.lt.s32.totalorder (!%p157_p3), %s1332_s12, 1  ;;  %v272_v0 = vld [vmem:[%s1763_s2 + $0x10] sm:$0xff] (!%p157_p3)  ;;  %v1342_v1 = vmov (!%p157_p3), 0   ;;  %v273_v2 = vld [vmem:[%s1763_s2 + $0x18] sm:$0xff] (!%p157_p3)  ;;  %v270_v3 = vld [vmem:[%s1763_s2] sm:$0xff] (!%p157_p3)  ;;  %vm600_vm0 = vcmask (!%p157_p3), 1041408  }
   0x7   : > { %160 = sbr.rel (%p157_p3) target bundleno = 462 (0x1ce), region = 32  ;;  %1301 = vset.pattern.permute.xlu1 (!%p157_p3), %v1342_v1  ;;  %639 = vmatprep.mubr.bf16.mxu0 (!%p157_p3), %v1342_v1  ;;  %v271_v4 = vld [vmem:[%s1763_s2 + $0x8] sm:$0xff] (!%p157_p3)  ;;  %v1302_v8 = vld [vmem:[%s1762_s1] sm:$0xff] (!%p157_p3)   ;;  %vm551_vm1 = vcmask (!%p157_p3), 31744   ;;  %v277_v12 = vld [vmem:[%s1763_s2 + $0x38] sm:$0xff] (!%p157_p3)  ;;  %vm204_vm2 = vcmask (!%p157_p3), 7168  }
   0x8   : > { %314 = vperm.xlu1 (!%p157_p3), %1301, %v272_v0   ;;  %719 = vmatprep.mubr.bf16.mxu1 (!%p157_p3), %v1342_v1  ;;  %v1303_v9 = vld [vmem:[%s1762_s1 + $0x40] sm:$0xff] (!%p157_p3)   ;;  %v275_v10 = vld [vmem:[%s1763_s2 + $0x28] sm:$0xff] (!%p157_p3)  ;;  %v276_v13 = vld [vmem:[%s1763_s2 + $0x30] sm:$0xff] (!%p157_p3)  ;;  %v1343_v52 = vmov (!%p157_p3), 0.0  }
   0x9   : > { %1300 = vset.pattern.permute.xlu0 (!%p157_p3), %v1342_v1  ;;  %v274_v11 = vld [vmem:[%s1763_s2 + $0x20] sm:$0xff] (!%p157_p3)  ;;  %v279_v14 = vld [vmem:[%s1763_s2 + $0x48] sm:$0xff] (!%p157_p3)  ;;  %v281_v18 = vld [vmem:[%s1763_s2 + $0x58] sm:$0xff] (!%p157_p3)  ;;  %221 = vst.msk [vmem:[#allocation2 + $0x80] sm:$0xff] (!%p157_p3), %vm204_vm2, %v1343_v52 }
   0xa   : > { %304 = vperm.xlu0 (!%p157_p3), %1300, %v270_v3   ;;  %v1304_v15 = vld [vmem:[%s1762_s1 + $0x8] sm:$0xff] (!%p157_p3)   ;;  %v278_v17 = vld [vmem:[%s1763_s2 + $0x40] sm:$0xff] (!%p157_p3)  ;;  %v280_v19 = vld [vmem:[%s1763_s2 + $0x50] sm:$0xff] (!%p157_p3)  ;;  %205 = vst.msk [vmem:[#allocation2] sm:$0xff] (!%p157_p3), %vm204_vm2, %v1343_v52 }
   0xb   : > { %v1305_v16 = vld [vmem:[%s1762_s1 + $0x48] sm:$0xff] (!%p157_p3)   ;;  %v1306_v20 = vld [vmem:[%s1762_s1 + $0x10] sm:$0xff] (!%p157_p3)   ;;  %v282_v23 = vld [vmem:[%s1763_s2 + $0x60] sm:$0xff] (!%p157_p3)  ;;  %206 = vst.msk [vmem:[#allocation2 + $0x8] sm:$0xff] (!%p157_p3), %vm204_vm2, %v1343_v52 }
   0xc   : > { %319 = vperm.xlu1 (!%p157_p3), %1301, %v273_v2   ;;  %v1307_v21 = vld [vmem:[%s1762_s1 + $0x50] sm:$0xff] (!%p157_p3)   ;;  %v283_v22 = vld [vmem:[%s1763_s2 + $0x68] sm:$0xff] (!%p157_p3)  ;;  %v285_v24 = vld [vmem:[%s1763_s2 + $0x78] sm:$0xff] (!%p157_p3)  ;;  %207 = vst.msk [vmem:[#allocation2 + $0x10] sm:$0xff] (!%p157_p3), %vm204_vm2, %v1343_v52 }
   0xd   : > { %v284_v25 = vld [vmem:[%s1763_s2 + $0x70] sm:$0xff] (!%p157_p3)  ;;  %v287_v26 = vld [vmem:[%s1763_s2 + $0x88] sm:$0xff] (!%p157_p3)  ;;  %v1308_v27 = vld [vmem:[%s1762_s1 + $0x18] sm:$0xff] (!%p157_p3)   ;;  %208 = vst.msk [vmem:[#allocation2 + $0x18] sm:$0xff] (!%p157_p3), %vm204_vm2, %v1343_v52 }
   0xe   : > { %s1770_s12 = smov (!%p185_p4, %s1332_s12), 1  ;;  %309 = vperm.xlu0 %1300, %v271_v4   ;;  %v1309_v28 = vld [vmem:[%s1762_s1 + $0x58] sm:$0xff]   ;;  %v286_v29 = vld [vmem:[%s1763_s2 + $0x80] sm:$0xff]  ;;  %v288_v31 = vld [vmem:[%s1763_s2 + $0x90] sm:$0xff]  ;;  %209 = vst.msk [vmem:[#allocation2 + $0x20] sm:$0xff] %vm204_vm2, %v1343_v52 }
   0xf   : > { %s1270_s22 = sshll.u32 %s1770_s12, 2  ;;  %v289_v30 = vld [vmem:[%s1763_s2 + $0x98] sm:$0xff]  ;;  %v291_v32 = vld [vmem:[%s1763_s2 + $0xa8] sm:$0xff]  ;;  %v1310_v33 = vld [vmem:[%s1762_s1 + $0x20] sm:$0xff]   ;;  %210 = vst.msk [vmem:[#allocation2 + $0x28] sm:$0xff] %vm204_vm2, %v1343_v52  ;;  %s1271_s24 = sshll.u32 %s1770_s12, 8 }
  0x10   : > { %s192_s25 = scalar_lea.vmem %s1761_s0, %s1270_s22  ;;  %329 = vperm.xlu1 %1301, %v275_v10   ;;  %v1311_v34 = vld [vmem:[%s1762_s1 + $0x60] sm:$0xff]   ;;  %v293_v36 = vld [vmem:[%s1763_s2 + $0xb8] sm:$0xff]  ;;  %v292_v37 = vld [vmem:[%s1763_s2 + $0xb0] sm:$0xff]  ;;  %211 = vst.msk [vmem:[#allocation2 + $0x30] sm:$0xff] %vm204_vm2, %v1343_v52  ;;  %s1658_s27 = scalar_lea.vmem %s1764_s3, %s1271_s24 }
  0x11   : > { %v1250_v5 = vld.sshfl [vmem:[%s192_s25] sm:$0x33 pattern:$0x76325410]  ;;  %v295_v38 = vld [vmem:[%s1763_s2 + $0xc8] sm:$0xff]  ;;  %v297_v42 = vld [vmem:[%s1763_s2 + $0xd8] sm:$0xff] }
  0x12   : > { %v550_v6 = vcombine.high %v1250_v5, %v1250_v5  ;;  %v602_v7 = vsel %vm600_vm0, %v1250_v5, 0  ;;  %324 = vperm.xlu0 %1300, %v274_v11   ;;  %v290_v35 = vld [vmem:[%s1763_s2 + $0xa0] sm:$0xff]  ;;  %v1312_v39 = vld [vmem:[%s1762_s1 + $0x28] sm:$0xff]   ;;  %v296_v43 = vld [vmem:[%s1763_s2 + $0xd0] sm:$0xff]  ;;  %212 = vst.msk [vmem:[#allocation2 + $0x38] sm:$0xff] %vm204_vm2, %v1343_v52 }
  0x13   : > { %v1313_v40 = vld [vmem:[%s1762_s1 + $0x68] sm:$0xff]   ;;  %v294_v41 = vld [vmem:[%s1763_s2 + $0xc0] sm:$0xff]  ;;  %v1314_v45 = vld [vmem:[%s1762_s1 + $0x30] sm:$0xff]   ;;  %213 = vst.msk [vmem:[#allocation2 + $0x40] sm:$0xff] %vm204_vm2, %v1343_v52 }
  0x14   : > { %1251 = vmatprep.subr.msk.bf16.mxu0 %vm600_vm0, %v550_v6  ;;  %1272 = vmatprep.subr.msk.bf16.mxu1 %vm600_vm0, %v550_v6  ;;  %v299_v44 = vld [vmem:[%s1763_s2 + $0xe8] sm:$0xff]  ;;  %v1315_v46 = vld [vmem:[%s1762_s1 + $0x70] sm:$0xff]   ;;  %v298_v47 = vld [vmem:[%s1763_s2 + $0xe0] sm:$0xff]  ;;  %214 = vst.msk [vmem:[#allocation2 + $0x48] sm:$0xff] %vm204_vm2, %v1343_v52 }
  0x15   : > { %608 = vmatpush1.bf16.msra.mxu0 %v602_v7  ;;  %1273 = vmatpush1.bf16.msra.mxu1 %v602_v7  ;;  %v301_v48 = vld [vmem:[%s1763_s2 + $0xf8] sm:$0xff]  ;;  %v300_v49 = vld [vmem:[%s1763_s2 + $0xf0] sm:$0xff]  ;;  %215 = vst.msk [vmem:[#allocation2 + $0x50] sm:$0xff] %vm204_vm2, %v1343_v52  ;;  %216 = vst.msk [vmem:[#allocation2 + $0x58] sm:$0xff] %vm204_vm2, %v1343_v52 }
  0x16   : > { %339 = vperm.xlu1 %1301, %v277_v12   ;;  %334 = vperm.xlu0 %1300, %v276_v13   ;;  %v1316_v50 = vld [vmem:[%s1762_s1 + $0x38] sm:$0xff]   ;;  %217 = vst.msk [vmem:[#allocation2 + $0x60] sm:$0xff] %vm204_vm2, %v1343_v52  ;;  %218 = vst.msk [vmem:[#allocation2 + $0x68] sm:$0xff] %vm204_vm2, %v1343_v52 }
  0x17   : > { %v1317_v51 = vld [vmem:[%s1762_s1 + $0x78] sm:$0xff]   ;;  %219 = vst.msk [vmem:[#allocation2 + $0x70] sm:$0xff] %vm204_vm2, %v1343_v52  ;;  %220 = vst.msk [vmem:[#allocation2 + $0x78] sm:$0xff] %vm204_vm2, %v1343_v52 }
  0x18   : > { %1252 = vmatmul.mubr.msk.bf16.vlgmr.msra.gmra.mrb[0].mxu0 %vm551_vm1, %v1302_v8  ;;  %1260 = vmatmul.mubr.msk.bf16.vlgmr.msra.gmra.mrb[0].mxu1 %vm551_vm1, %v1303_v9  ;;  %222 = vst.msk [vmem:[#allocation2 + $0x88] sm:$0xff] %vm204_vm2, %v1343_v52  ;;  %223 = vst.msk [vmem:[#allocation2 + $0x90] sm:$0xff] %vm204_vm2, %v1343_v52 }
  0x19   : > { %649 = vmatprep.mubr.bf16.mxu0 %v1342_v1  ;;  %729 = vmatprep.mubr.bf16.mxu1 %v1342_v1  ;;  %224 = vst.msk [vmem:[#allocation2 + $0x98] sm:$0xff] %vm204_vm2, %v1343_v52  ;;  %225 = vst.msk [vmem:[#allocation2 + $0xa0] sm:$0xff] %vm204_vm2, %v1343_v52 }
  0x1a   : > { %349 = vperm.xlu1 %1301, %v279_v14   ;;  %344 = vperm.xlu0 %1300, %v278_v17   ;;  %226 = vst.msk [vmem:[#allocation2 + $0xa8] sm:$0xff] %vm204_vm2, %v1343_v52  ;;  %227 = vst.msk [vmem:[#allocation2 + $0xb0] sm:$0xff] %vm204_vm2, %v1343_v52 }
  0x1b   : > { %228 = vst.msk [vmem:[#allocation2 + $0xb8] sm:$0xff] %vm204_vm2, %v1343_v52  ;;  %229 = vst.msk [vmem:[#allocation2 + $0xc0] sm:$0xff] %vm204_vm2, %v1343_v52 }
  0x1c   : > { %230 = vst.msk [vmem:[#allocation2 + $0xc8] sm:$0xff] %vm204_vm2, %v1343_v52  ;;  %231 = vst.msk [vmem:[#allocation2 + $0xd0] sm:$0xff] %vm204_vm2, %v1343_v52 }
  0x1d   : > { %232 = vst.msk [vmem:[#allocation2 + $0xd8] sm:$0xff] %vm204_vm2, %v1343_v52  ;;  %233 = vst.msk [vmem:[#allocation2 + $0xe0] sm:$0xff] %vm204_vm2, %v1343_v52 }
  0x1e   : > { %359 = vperm.xlu1 %1301, %v281_v18   ;;  %354 = vperm.xlu0 %1300, %v280_v19   ;;  %234 = vst.msk [vmem:[#allocation2 + $0xe8] sm:$0xff] %vm204_vm2, %v1343_v52  ;;  %235 = vst.msk [vmem:[#allocation2 + $0xf0] sm:$0xff] %vm204_vm2, %v1343_v52 }
  0x1f   : > { %236 = vst.msk [vmem:[#allocation2 + $0xf8] sm:$0xff] %vm204_vm2, %v1343_v52 }
  0x20   : > { %1253 = vmatmul.mubr.msk.bf16.gmra.mrb[4].mxu0 %vm551_vm1, %v1304_v15  ;;  %1261 = vmatmul.mubr.msk.bf16.gmra.mrb[4].mxu1 %vm551_vm1, %v1305_v16 }
  0x21   : > { %659 = vmatprep.mubr.bf16.mxu0 %v1342_v1  ;;  %739 = vmatprep.mubr.bf16.mxu1 %v1342_v1 }
  0x22   : > { %369 = vperm.xlu1 %1301, %v283_v22   ;;  %364 = vperm.xlu0 %1300, %v282_v23  }
  0x26   : > { %379 = vperm.xlu1 %1301, %v285_v24   ;;  %374 = vperm.xlu0 %1300, %v284_v25  }
  0x28   : > { %1254 = vmatmul.mubr.msk.bf16.gmra.mrb[8].mxu0 %vm551_vm1, %v1306_v20  ;;  %1262 = vmatmul.mubr.msk.bf16.gmra.mrb[8].mxu1 %vm551_vm1, %v1307_v21 }
  0x29   : > { %669 = vmatprep.mubr.bf16.mxu0 %v1342_v1  ;;  %749 = vmatprep.mubr.bf16.mxu1 %v1342_v1 }
  0x2a   : > { %389 = vperm.xlu1 %1301, %v287_v26   ;;  %384 = vperm.xlu0 %1300, %v286_v29  }
  0x2e   : > { %399 = vperm.xlu1 %1301, %v289_v30   ;;  %394 = vperm.xlu0 %1300, %v288_v31  }
  0x30   : > { %1255 = vmatmul.mubr.msk.bf16.gmra.mrb[12].mxu0 %vm551_vm1, %v1308_v27  ;;  %1263 = vmatmul.mubr.msk.bf16.gmra.mrb[12].mxu1 %vm551_vm1, %v1309_v28 }
  0x31   : > { %679 = vmatprep.mubr.bf16.mxu0 %v1342_v1  ;;  %759 = vmatprep.mubr.bf16.mxu1 %v1342_v1 }
  0x32   : > { %409 = vperm.xlu1 %1301, %v291_v32   ;;  %404 = vperm.xlu0 %1300, %v290_v35  }
  0x36   : > { %419 = vperm.xlu1 %1301, %v293_v36   ;;  %414 = vperm.xlu0 %1300, %v292_v37  }
  0x38   : > { %1256 = vmatmul.mubr.msk.bf16.gmra.mrb[16].mxu0 %vm551_vm1, %v1310_v33  ;;  %1264 = vmatmul.mubr.msk.bf16.gmra.mrb[16].mxu1 %vm551_vm1, %v1311_v34 }
  0x39   : > { %689 = vmatprep.mubr.bf16.mxu0 %v1342_v1  ;;  %769 = vmatprep.mubr.bf16.mxu1 %v1342_v1 }
  0x3a   : > { %429 = vperm.xlu1 %1301, %v295_v38   ;;  %424 = vperm.xlu0 %1300, %v294_v41  }
  0x3e   : > { %439 = vperm.xlu1 %1301, %v297_v42   ;;  %434 = vperm.xlu0 %1300, %v296_v43  }
  0x40   : > { %1257 = vmatmul.mubr.msk.bf16.gmra.mrb[20].mxu0 %vm551_vm1, %v1312_v39  ;;  %1265 = vmatmul.mubr.msk.bf16.gmra.mrb[20].mxu1 %vm551_vm1, %v1313_v40 }
  0x41   : > { %699 = vmatprep.mubr.bf16.mxu0 %v1342_v1  ;;  %779 = vmatprep.mubr.bf16.mxu1 %v1342_v1 }
  0x42   : > { %449 = vperm.xlu1 %1301, %v299_v44   ;;  %444 = vperm.xlu0 %1300, %v298_v47  }
  0x46   : > { %459 = vperm.xlu1 %1301, %v301_v48   ;;  %454 = vperm.xlu0 %1300, %v300_v49  }
  0x48   : > { %1258 = vmatmul.mubr.msk.bf16.gmra.mrb[24].mxu0 %vm551_vm1, %v1314_v45  ;;  %1266 = vmatmul.mubr.msk.bf16.gmra.mrb[24].mxu1 %vm551_vm1, %v1315_v46 }
  0x49   : > { %709 = vmatprep.mubr.bf16.mxu0 %v1342_v1  ;;  %789 = vmatprep.mubr.bf16.mxu1 %v1342_v1 }
  0x50   : > { %1259 = vmatmul.mubr.msk.bf16.gmra.mrb[28].mxu0 %vm551_vm1, %v1316_v50  ;;  %1267 = vmatmul.mubr.msk.bf16.gmra.mrb[28].mxu1 %vm551_vm1, %v1317_v51 }
  0x87   : > { %v315_v53 = vpop.permute.xlu1 %314 }
  0x89   : > { %v305_v54 = vpop.permute.xlu0 %304 }
  0x8b   : > { %v1598_v55 = vpop.permute.xlu1 %319 }
  0x8d   : > { %v310_v56 = vpop.permute.xlu0 %309 }
  0x8f   : > { %v1600_v57 = vpop.permute.xlu1 %329 }
  0x91   : > { %v1602_v58 = vpop.permute.xlu0 %324 }
  0x95   : > { %v1604_v59 = vpop.permute.xlu1 %339  ;;  %v1606_v60 = vpop.permute.xlu0 %334 }
  0x99   : > { %v1608_v61 = vpop.permute.xlu1 %349  ;;  %v1610_v62 = vpop.permute.xlu0 %344 }
  0x9d   : > { %v1612_v63 = vpop.permute.xlu1 %359  ;;  %v1614_v0 = vpop.permute.xlu0 %354 }
  0xa1   : > { %v1616_v1 = vpop.permute.xlu1 %369  ;;  %v1618_v2 = vpop.permute.xlu0 %364 }
  0xa5   : > { %v1620_v3 = vpop.permute.xlu1 %379  ;;  %v1622_v4 = vpop.permute.xlu0 %374 }
  0xa9   : > { %v390_v5 = vpop.permute.xlu1 %389  ;;  %v385_v6 = vpop.permute.xlu0 %384 }
  0xad   : > { %v400_v33 = vpop.permute.xlu1 %399  ;;  %v395_v34 = vpop.permute.xlu0 %394 }
  0xeb   : > { %v641_v7 = vpop.f32.mrb[0].mxu0  ;;  %v721_v8 = vpop.f32.mrb[0].mxu1 }
  0xec   : > { %v642_v9 = vadd.f32 %v641_v7, %v305_v54  ;;  %v722_v10 = vadd.f32 %v721_v8, %v385_v6  ;;  %v643_v11 = vpop.f32.mrb[1].mxu0  ;;  %v723_v12 = vpop.f32.mrb[1].mxu1 }
  0xed   : > { %v644_v13 = vadd.f32 %v643_v11, %v305_v54  ;;  %v724_v14 = vadd.f32 %v723_v12, %v385_v6  ;;  %v645_v15 = vpop.f32.mrb[2].mxu0  ;;  %v725_v16 = vpop.f32.mrb[2].mxu1 }
  0xee   : > { %v800_v17 = vmax.f32 %v642_v9, 0.0  ;;  %v832_v18 = vmax.f32 %v722_v10, 0.0  ;;  %v646_v19 = vadd.f32 %v645_v15, %v310_v56  ;;  %v726_v20 = vadd.f32 %v725_v16, %v390_v5  ;;  %v647_v21 = vpop.f32.mrb[3].mxu0  ;;  %v727_v22 = vpop.f32.mrb[3].mxu1 }
  0xef   : > { %v801_v23 = vmax.f32 %v644_v13, 0.0  ;;  %v833_v24 = vmax.f32 %v724_v14, 0.0  ;;  %v648_v25 = vadd.f32 %v647_v21, %v310_v56  ;;  %v728_v26 = vadd.f32 %v727_v22, %v390_v5  ;;  %v410_v12 = vpop.permute.xlu1 %409  ;;  %v405_v13 = vpop.permute.xlu0 %404 }
  0xf0   : > { %v802_v27 = vmax.f32 %v646_v19, 0.0  ;;  %v834_v28 = vmax.f32 %v726_v20, 0.0 }
  0xf1   : > { %v803_v29 = vmax.f32 %v648_v25, 0.0  ;;  %v835_v30 = vmax.f32 %v728_v26, 0.0  ;;  %v944_v31 = vadd.f32 %v833_v24, %v832_v18  ;;  %v896_v32 = vadd.f32 %v801_v23, %v800_v17 }
  0xf3   : > { %v731_v35 = vpop.f32.mrb[4].mxu1  ;;  %945 = vadd.xlane.f32.xlu1 %v944_v31  ;;  %v651_v36 = vpop.f32.mrb[4].mxu0  ;;  %897 = vadd.xlane.f32.xlu0 %v896_v32  ;;  %v899_v37 = vadd.f32 %v803_v29, %v802_v27  ;;  %v947_v38 = vadd.f32 %v835_v30, %v834_v28 }
  0xf4   : > { %v732_v39 = vadd.f32 %v731_v35, %v395_v34  ;;  %v652_v40 = vadd.f32 %v651_v36, %v315_v53  ;;  %v653_v41 = vpop.f32.mrb[5].mxu0  ;;  %v733_v42 = vpop.f32.mrb[5].mxu1 }
  0xf5   : > { %v654_v43 = vadd.f32 %v653_v41, %v315_v53  ;;  %v734_v44 = vadd.f32 %v733_v42, %v395_v34  ;;  %v655_v45 = vpop.f32.mrb[6].mxu0  ;;  %v735_v46 = vpop.f32.mrb[6].mxu1 }
  0xf6   : > { %v836_v47 = vmax.f32 %v732_v39, 0.0  ;;  %v804_v48 = vmax.f32 %v652_v40, 0.0  ;;  %v656_v49 = vadd.f32 %v655_v45, %v1598_v55  ;;  %v736_v50 = vadd.f32 %v735_v46, %v400_v33  ;;  %v657_v51 = vpop.f32.mrb[7].mxu0  ;;  %v737_v52 = vpop.f32.mrb[7].mxu1 }
  0xf7   : > { %v805_v54 = vmax.f32 %v654_v43, 0.0  ;;  %v837_v56 = vmax.f32 %v734_v44, 0.0  ;;  %v658_v5 = vadd.f32 %v657_v51, %v1598_v55  ;;  %v738_v6 = vadd.f32 %v737_v52, %v400_v33  ;;  %900 = vadd.xlane.f32.xlu1 %v899_v37  ;;  %948 = vadd.xlane.f32.xlu0 %v947_v38  ;;  %v420_v40 = vpop.permute.xlu1 %419  ;;  %v415_v41 = vpop.permute.xlu0 %414 }
  0xf8   : > { %v806_v7 = vmax.f32 %v656_v49, 0.0  ;;  %v838_v8 = vmax.f32 %v736_v50, 0.0 }
  0xf9   : > { %v807_v53 = vmax.f32 %v658_v5, 0.0  ;;  %v839_v9 = vmax.f32 %v738_v6, 0.0  ;;  %v950_v10 = vadd.f32 %v837_v56, %v836_v47  ;;  %v902_v11 = vadd.f32 %v805_v54, %v804_v48 }
  0xfb   : > { %v661_v14 = vpop.f32.mrb[8].mxu0  ;;  %v741_v15 = vpop.f32.mrb[8].mxu1  ;;  %951 = vadd.xlane.f32.xlu1 %v950_v10  ;;  %903 = vadd.xlane.f32.xlu0 %v902_v11  ;;  %v905_v16 = vadd.f32 %v807_v53, %v806_v7  ;;  %v953_v17 = vadd.f32 %v839_v9, %v838_v8 }
  0xfc   : > { %v662_v18 = vadd.f32 %v661_v14, %v1602_v58  ;;  %v742_v55 = vadd.f32 %v741_v15, %v405_v13  ;;  %v663_v19 = vpop.f32.mrb[9].mxu0  ;;  %v743_v20 = vpop.f32.mrb[9].mxu1 }
  0xfd   : > { %v664_v21 = vadd.f32 %v663_v19, %v1602_v58  ;;  %v744_v22 = vadd.f32 %v743_v20, %v405_v13  ;;  %v665_v23 = vpop.f32.mrb[10].mxu0  ;;  %v745_v24 = vpop.f32.mrb[10].mxu1 }
  0xfe   : > { %v808_v25 = vmax.f32 %v662_v18, 0.0  ;;  %v840_v26 = vmax.f32 %v742_v55, 0.0  ;;  %v666_v27 = vadd.f32 %v665_v23, %v1600_v57  ;;  %v746_v28 = vadd.f32 %v745_v24, %v410_v12  ;;  %v667_v29 = vpop.f32.mrb[11].mxu0  ;;  %v747_v30 = vpop.f32.mrb[11].mxu1 }
  0xff   : > { %v809_v31 = vmax.f32 %v664_v21, 0.0  ;;  %v841_v32 = vmax.f32 %v744_v22, 0.0  ;;  %v668_v33 = vadd.f32 %v667_v29, %v1600_v57  ;;  %v748_v34 = vadd.f32 %v747_v30, %v410_v12  ;;  %906 = vadd.xlane.f32.xlu0 %v905_v16  ;;  %v425_v18 = vpop.permute.xlu0 %424 }
 0x100   : > { %v810_v35 = vmax.f32 %v666_v27, 0.0  ;;  %v842_v36 = vmax.f32 %v746_v28, 0.0 }
 0x101   : > { %v811_v37 = vmax.f32 %v668_v33, 0.0  ;;  %v843_v58 = vmax.f32 %v748_v34, 0.0  ;;  %v908_v38 = vadd.f32 %v809_v31, %v808_v25  ;;  %v956_v39 = vadd.f32 %v841_v32, %v840_v26 }
 0x103   : > { %v671_v42 = vpop.f32.mrb[12].mxu0  ;;  %v751_v43 = vpop.f32.mrb[12].mxu1  ;;  %909 = vadd.xlane.f32.xlu1 %v908_v38  ;;  %954 = vadd.xlane.f32.xlu0 %v953_v17  ;;  %v911_v44 = vadd.f32 %v811_v37, %v810_v35  ;;  %v959_v45 = vadd.f32 %v843_v58, %v842_v36 }
 0x104   : > { %v672_v46 = vadd.f32 %v671_v42, %v1606_v60  ;;  %v752_v47 = vadd.f32 %v751_v43, %v415_v41  ;;  %v673_v57 = vpop.f32.mrb[13].mxu0  ;;  %v753_v48 = vpop.f32.mrb[13].mxu1 }
 0x105   : > { %v674_v49 = vadd.f32 %v673_v57, %v1606_v60  ;;  %v754_v50 = vadd.f32 %v753_v48, %v415_v41  ;;  %v675_v51 = vpop.f32.mrb[14].mxu0  ;;  %v755_v52 = vpop.f32.mrb[14].mxu1 }
 0x106   : > { %v812_v54 = vmax.f32 %v672_v46, 0.0  ;;  %v844_v56 = vmax.f32 %v752_v47, 0.0  ;;  %v676_v5 = vadd.f32 %v675_v51, %v1604_v59  ;;  %v756_v6 = vadd.f32 %v755_v52, %v420_v40  ;;  %v677_v7 = vpop.f32.mrb[15].mxu0  ;;  %v757_v8 = vpop.f32.mrb[15].mxu1 }
 0x107   : > { %v813_v53 = vmax.f32 %v674_v49, 0.0  ;;  %v845_v9 = vmax.f32 %v754_v50, 0.0  ;;  %v678_v10 = vadd.f32 %v677_v7, %v1604_v59  ;;  %v758_v11 = vadd.f32 %v757_v8, %v420_v40  ;;  %957 = vadd.xlane.f32.xlu1 %v956_v39  ;;  %912 = vadd.xlane.f32.xlu0 %v911_v44  ;;  %v430_v17 = vpop.permute.xlu1 %429  ;;  %v435_v44 = vpop.permute.xlu0 %434 }
 0x108   : > { %v814_v12 = vmax.f32 %v676_v5, 0.0  ;;  %v846_v13 = vmax.f32 %v756_v6, 0.0 }
 0x109   : > { %v815_v60 = vmax.f32 %v678_v10, 0.0  ;;  %v847_v14 = vmax.f32 %v758_v11, 0.0  ;;  %v914_v15 = vadd.f32 %v813_v53, %v812_v54  ;;  %v962_v16 = vadd.f32 %v845_v9, %v844_v56 }
 0x10b   : > { %v681_v55 = vpop.f32.mrb[16].mxu0  ;;  %v761_v19 = vpop.f32.mrb[16].mxu1  ;;  %915 = vadd.xlane.f32.xlu1 %v914_v15  ;;  %960 = vadd.xlane.f32.xlu0 %v959_v45  ;;  %v917_v20 = vadd.f32 %v815_v60, %v814_v12  ;;  %v965_v21 = vadd.f32 %v847_v14, %v846_v13 }
 0x10c   : > { %v682_v22 = vadd.f32 %v681_v55, %v1610_v62  ;;  %v762_v59 = vadd.f32 %v761_v19, %v425_v18  ;;  %v683_v23 = vpop.f32.mrb[17].mxu0  ;;  %v763_v24 = vpop.f32.mrb[17].mxu1 }
 0x10d   : > { %v684_v25 = vadd.f32 %v683_v23, %v1610_v62  ;;  %v764_v26 = vadd.f32 %v763_v24, %v425_v18  ;;  %v685_v27 = vpop.f32.mrb[18].mxu0  ;;  %v765_v28 = vpop.f32.mrb[18].mxu1 }
 0x10e   : > { %v816_v29 = vmax.f32 %v682_v22, 0.0  ;;  %v848_v30 = vmax.f32 %v762_v59, 0.0  ;;  %v686_v31 = vadd.f32 %v685_v27, %v1608_v61  ;;  %v766_v32 = vadd.f32 %v765_v28, %v430_v17  ;;  %v687_v33 = vpop.f32.mrb[19].mxu0  ;;  %v767_v34 = vpop.f32.mrb[19].mxu1 }
 0x10f   : > { %v817_v35 = vmax.f32 %v684_v25, 0.0  ;;  %v849_v36 = vmax.f32 %v764_v26, 0.0  ;;  %v688_v37 = vadd.f32 %v687_v33, %v1608_v61  ;;  %v768_v58 = vadd.f32 %v767_v34, %v430_v17  ;;  %963 = vadd.xlane.f32.xlu1 %v962_v16  ;;  %918 = vadd.xlane.f32.xlu0 %v917_v20  ;;  %v440_v43 = vpop.permute.xlu1 %439  ;;  %v445_v55 = vpop.permute.xlu0 %444 }
 0x110   : > { %v818_v38 = vmax.f32 %v686_v31, 0.0  ;;  %v850_v39 = vmax.f32 %v766_v32, 0.0 }
 0x111   : > { %v819_v62 = vmax.f32 %v688_v37, 0.0  ;;  %v851_v40 = vmax.f32 %v768_v58, 0.0  ;;  %v920_v41 = vadd.f32 %v817_v35, %v816_v29  ;;  %v968_v42 = vadd.f32 %v849_v36, %v848_v30 }
 0x113   : > { %v691_v45 = vpop.f32.mrb[20].mxu0  ;;  %v771_v46 = vpop.f32.mrb[20].mxu1  ;;  %921 = vadd.xlane.f32.xlu1 %v920_v41  ;;  %966 = vadd.xlane.f32.xlu0 %v965_v21  ;;  %v923_v47 = vadd.f32 %v819_v62, %v818_v38  ;;  %v971_v57 = vadd.f32 %v851_v40, %v850_v39 }
 0x114   : > { %v692_v48 = vadd.f32 %v691_v45, %v1614_v0  ;;  %v772_v61 = vadd.f32 %v771_v46, %v435_v44  ;;  %v693_v49 = vpop.f32.mrb[21].mxu0  ;;  %v773_v50 = vpop.f32.mrb[21].mxu1 }
 0x115   : > { %v694_v51 = vadd.f32 %v693_v49, %v1614_v0  ;;  %v774_v52 = vadd.f32 %v773_v50, %v435_v44  ;;  %v695_v54 = vpop.f32.mrb[22].mxu0  ;;  %v775_v56 = vpop.f32.mrb[22].mxu1 }
 0x116   : > { %v820_v5 = vmax.f32 %v692_v48, 0.0  ;;  %v852_v6 = vmax.f32 %v772_v61, 0.0  ;;  %v696_v7 = vadd.f32 %v695_v54, %v1612_v63  ;;  %v776_v8 = vadd.f32 %v775_v56, %v440_v43  ;;  %v697_v53 = vpop.f32.mrb[23].mxu0  ;;  %v777_v9 = vpop.f32.mrb[23].mxu1 }
 0x117   : > { %v821_v10 = vmax.f32 %v694_v51, 0.0  ;;  %v853_v11 = vmax.f32 %v774_v52, 0.0  ;;  %v698_v12 = vadd.f32 %v697_v53, %v1612_v63  ;;  %v778_v13 = vadd.f32 %v777_v9, %v440_v43  ;;  %969 = vadd.xlane.f32.xlu1 %v968_v42  ;;  %924 = vadd.xlane.f32.xlu0 %v923_v47  ;;  %v450_v18 = vpop.permute.xlu1 %449  ;;  %v455_v43 = vpop.permute.xlu0 %454 }
 0x118   : > { %v822_v60 = vmax.f32 %v696_v7, 0.0  ;;  %v854_v14 = vmax.f32 %v776_v8, 0.0 }
 0x119   : > { %v823_v0 = vmax.f32 %v698_v12, 0.0  ;;  %v855_v15 = vmax.f32 %v778_v13, 0.0  ;;  %v926_v16 = vadd.f32 %v821_v10, %v820_v5  ;;  %v974_v17 = vadd.f32 %v853_v11, %v852_v6 }
 0x11b   : > { %v701_v19 = vpop.f32.mrb[24].mxu0  ;;  %v781_v20 = vpop.f32.mrb[24].mxu1  ;;  %927 = vadd.xlane.f32.xlu1 %v926_v16  ;;  %972 = vadd.xlane.f32.xlu0 %v971_v57  ;;  %v929_v21 = vadd.f32 %v823_v0, %v822_v60  ;;  %v977_v22 = vadd.f32 %v855_v15, %v854_v14 }
 0x11c   : > { %v702_v59 = vadd.f32 %v701_v19, %v1618_v2  ;;  %v782_v63 = vadd.f32 %v781_v20, %v445_v55  ;;  %v703_v23 = vpop.f32.mrb[25].mxu0  ;;  %v783_v24 = vpop.f32.mrb[25].mxu1 }
 0x11d   : > { %v704_v25 = vadd.f32 %v703_v23, %v1618_v2  ;;  %v784_v26 = vadd.f32 %v783_v24, %v445_v55  ;;  %v705_v27 = vpop.f32.mrb[26].mxu0  ;;  %v785_v28 = vpop.f32.mrb[26].mxu1 }
 0x11e   : > { %v824_v29 = vmax.f32 %v702_v59, 0.0  ;;  %v856_v30 = vmax.f32 %v782_v63, 0.0  ;;  %v706_v31 = vadd.f32 %v705_v27, %v1616_v1  ;;  %v786_v32 = vadd.f32 %v785_v28, %v450_v18  ;;  %v707_v33 = vpop.f32.mrb[27].mxu0  ;;  %v787_v34 = vpop.f32.mrb[27].mxu1 }
 0x11f   : > { %v825_v35 = vmax.f32 %v704_v25, 0.0  ;;  %v857_v36 = vmax.f32 %v784_v26, 0.0  ;;  %v708_v37 = vadd.f32 %v707_v33, %v1616_v1  ;;  %v788_v58 = vadd.f32 %v787_v34, %v450_v18  ;;  %975 = vadd.xlane.f32.xlu1 %v974_v17  ;;  %930 = vadd.xlane.f32.xlu0 %v929_v21  ;;  %v460_v42 = vpop.permute.xlu1 %459  ;;  %v880_v17 = vld [vmem:[#allocation2 + $0x80] sm:$0xff]  ;;  %v865_v21 = vld [vmem:[#allocation2 + $0x8] sm:$0xff]  ;;  %v882_v25 = vld [vmem:[#allocation2 + $0x90] sm:$0xff] }
 0x120   : > { %v826_v38 = vmax.f32 %v706_v31, 0.0  ;;  %v858_v39 = vmax.f32 %v786_v32, 0.0  ;;  %v864_v18 = vld [vmem:[#allocation2] sm:$0xff]  ;;  %v866_v26 = vld [vmem:[#allocation2 + $0x10] sm:$0xff]  ;;  %v867_v33 = vld [vmem:[#allocation2 + $0x18] sm:$0xff] }
 0x121   : > { %v827_v2 = vmax.f32 %v708_v37, 0.0  ;;  %v859_v62 = vmax.f32 %v788_v58, 0.0  ;;  %v932_v40 = vadd.f32 %v825_v35, %v824_v29  ;;  %v980_v41 = vadd.f32 %v857_v36, %v856_v30  ;;  %v868_v58 = vld [vmem:[#allocation2 + $0x20] sm:$0xff] }
 0x123   : > { %v711_v44 = vpop.f32.mrb[28].mxu0  ;;  %v791_v45 = vpop.f32.mrb[28].mxu1  ;;  %933 = vadd.xlane.f32.xlu1 %v932_v40  ;;  %978 = vadd.xlane.f32.xlu0 %v977_v22  ;;  %v935_v46 = vadd.f32 %v827_v2, %v826_v38  ;;  %v983_v47 = vadd.f32 %v859_v62, %v858_v39  ;;  %v881_v22 = vld [vmem:[#allocation2 + $0x88] sm:$0xff]  ;;  %v883_v2 = vld [vmem:[#allocation2 + $0x98] sm:$0xff] }
 0x124   : > { %v712_v57 = vadd.f32 %v711_v44, %v1622_v4  ;;  %v792_v1 = vadd.f32 %v791_v45, %v455_v43  ;;  %v713_v48 = vpop.f32.mrb[29].mxu0  ;;  %v793_v61 = vpop.f32.mrb[29].mxu1  ;;  %v884_v45 = vld [vmem:[#allocation2 + $0xa0] sm:$0xff] }
 0x125   : > { %v714_v49 = vadd.f32 %v713_v48, %v1622_v4  ;;  %v794_v50 = vadd.f32 %v793_v61, %v455_v43  ;;  %v715_v51 = vpop.f32.mrb[30].mxu0  ;;  %v795_v52 = vpop.f32.mrb[30].mxu1 }
 0x126   : > { %v828_v54 = vmax.f32 %v712_v57, 0.0  ;;  %v860_v56 = vmax.f32 %v792_v1, 0.0  ;;  %v716_v5 = vadd.f32 %v715_v51, %v1620_v3  ;;  %v796_v6 = vadd.f32 %v795_v52, %v460_v42  ;;  %v717_v7 = vpop.f32.mrb[31].mxu0  ;;  %v797_v8 = vpop.f32.mrb[31].mxu1  ;;  %v869_v57 = vld [vmem:[#allocation2 + $0x28] sm:$0xff] }
 0x127   : > { %v829_v53 = vmax.f32 %v714_v49, 0.0  ;;  %v861_v9 = vmax.f32 %v794_v50, 0.0  ;;  %v718_v10 = vadd.f32 %v717_v7, %v1620_v3  ;;  %v798_v11 = vadd.f32 %v797_v8, %v460_v42  ;;  %981 = vadd.xlane.f32.xlu1 %v980_v41  ;;  %936 = vadd.xlane.f32.xlu0 %v935_v46 }
 0x128   : > { %v830_v12 = vmax.f32 %v716_v5, 0.0  ;;  %v862_v13 = vmax.f32 %v796_v6, 0.0 }
 0x129   : > { %v831_v4 = vmax.f32 %v718_v10, 0.0  ;;  %v863_v60 = vmax.f32 %v798_v11, 0.0  ;;  %v938_v14 = vadd.f32 %v829_v53, %v828_v54  ;;  %v986_v0 = vadd.f32 %v861_v9, %v860_v56  ;;  %v870_v54 = vld [vmem:[#allocation2 + $0x30] sm:$0xff]  ;;  %v885_v56 = vld [vmem:[#allocation2 + $0xa8] sm:$0xff] }
 0x12a   : > { %v886_v9 = vld [vmem:[#allocation2 + $0xb0] sm:$0xff] }
 0x12b   : > { %939 = vadd.xlane.f32.xlu1 %v938_v14  ;;  %984 = vadd.xlane.f32.xlu0 %v983_v47  ;;  %v941_v15 = vadd.f32 %v831_v4, %v830_v12  ;;  %v989_v16 = vadd.f32 %v863_v60, %v862_v13  ;;  %v871_v12 = vld [vmem:[#allocation2 + $0x38] sm:$0xff] }
 0x12f   : > { %987 = vadd.xlane.f32.xlu1 %v986_v0  ;;  %942 = vadd.xlane.f32.xlu0 %v941_v15 }
 0x133   : > { %990 = vadd.xlane.f32.xlu0 %v989_v16  ;;  %v872_v16 = vld [vmem:[#allocation2 + $0x40] sm:$0xff] }
 0x180   : > { %v946_v3 = vpop.xlane.xlu1 %945  ;;  %v898_v55 = vpop.xlane.xlu0 %897 }
 0x181   : > { %v1008_v19 = vadd.f32 %v946_v3, %v880_v17  ;;  %v992_v20 = vadd.f32 %v898_v55, %v864_v18  ;;  %v887_v3 = vld [vmem:[#allocation2 + $0xb8] sm:$0xff] }
 0x183   : > { %1041 = vst.msk [vmem:[#allocation2 + $0x80] sm:$0xff] %vm204_vm2, %v1008_v19  ;;  %1025 = vst.msk [vmem:[#allocation2] sm:$0xff] %vm204_vm2, %v992_v20 }
 0x184   : > { %v901_v59 = vpop.xlane.xlu1 %900  ;;  %v949_v63 = vpop.xlane.xlu0 %948 }
 0x185   : > { %v993_v23 = vadd.f32 %v901_v59, %v865_v21  ;;  %v1009_v24 = vadd.f32 %v949_v63, %v881_v22  ;;  %v888_v63 = vld [vmem:[#allocation2 + $0xc0] sm:$0xff] }
 0x187   : > { %1026 = vst.msk [vmem:[#allocation2 + $0x8] sm:$0xff] %vm204_vm2, %v993_v23  ;;  %1042 = vst.msk [vmem:[#allocation2 + $0x88] sm:$0xff] %vm204_vm2, %v1009_v24 }
 0x188   : > { %v952_v27 = vpop.xlane.xlu1 %951  ;;  %v904_v28 = vpop.xlane.xlu0 %903 }
 0x189   : > { %v1010_v29 = vadd.f32 %v952_v27, %v882_v25  ;;  %v994_v30 = vadd.f32 %v904_v28, %v866_v26  ;;  %v873_v25 = vld [vmem:[#allocation2 + $0x48] sm:$0xff] }
 0x18a   : > { %v1076_v31 = vld [vmem:[#allocation2 + $0x80] sm:$0xff] }
 0x18b   : > { %v1060_v32 = vld [vmem:[#allocation2] sm:$0xff]  ;;  %v1108_v34 = vmul.f32 0.00390625, %v1076_v31  ;;  %1043 = vst.msk [vmem:[#allocation2 + $0x90] sm:$0xff] %vm204_vm2, %v1010_v29  ;;  %1027 = vst.msk [vmem:[#allocation2 + $0x10] sm:$0xff] %vm204_vm2, %v994_v30 }
 0x18c   : > { %v1092_v35 = vmul.f32 0.00390625, %v1060_v32  ;;  %v907_v36 = vpop.xlane.xlu0 %906  ;;  %v874_v32 = vld [vmem:[#allocation2 + $0x50] sm:$0xff] }
 0x18d   : > { %1140 = vst.msk [vmem:[%s1658_s27 + $0x80] sm:$0xff] %vm204_vm2, %v1108_v34  ;;  %v995_v37 = vadd.f32 %v907_v36, %v867_v33 }
 0x18e   : > { %1124 = vst.msk [vmem:[%s1658_s27] sm:$0xff] %vm204_vm2, %v1092_v35  ;;  %v1061_v38 = vld [vmem:[#allocation2 + $0x8] sm:$0xff] }
 0x18f   : > { %v1077_v39 = vld [vmem:[#allocation2 + $0x88] sm:$0xff]  ;;  %v1093_v62 = vmul.f32 0.00390625, %v1061_v38  ;;  %1028 = vst.msk [vmem:[#allocation2 + $0x18] sm:$0xff] %vm204_vm2, %v995_v37 }
 0x190   : > { %v1109_v40 = vmul.f32 0.00390625, %v1077_v39  ;;  %v910_v41 = vpop.xlane.xlu1 %909  ;;  %v955_v42 = vpop.xlane.xlu0 %954  ;;  %v889_v35 = vld [vmem:[#allocation2 + $0xc8] sm:$0xff] }
 0x191   : > { %1125 = vst.msk [vmem:[%s1658_s27 + $0x8] sm:$0xff] %vm204_vm2, %v1093_v62  ;;  %v996_v43 = vadd.f32 %v910_v41, %v868_v58  ;;  %v1011_v44 = vadd.f32 %v955_v42, %v883_v2  ;;  %v890_v62 = vld [vmem:[#allocation2 + $0xd0] sm:$0xff]  ;;  %v875_v42 = vld [vmem:[#allocation2 + $0x58] sm:$0xff] }
 0x192   : > { %1141 = vst.msk [vmem:[%s1658_s27 + $0x88] sm:$0xff] %vm204_vm2, %v1109_v40  ;;  %v1078_v46 = vld [vmem:[#allocation2 + $0x90] sm:$0xff] }
 0x193   : > { %v1062_v47 = vld [vmem:[#allocation2 + $0x10] sm:$0xff]  ;;  %v1110_v1 = vmul.f32 0.00390625, %v1078_v46  ;;  %1029 = vst.msk [vmem:[#allocation2 + $0x20] sm:$0xff] %vm204_vm2, %v996_v43  ;;  %1044 = vst.msk [vmem:[#allocation2 + $0x98] sm:$0xff] %vm204_vm2, %v1011_v44 }
 0x194   : > { %v1094_v48 = vmul.f32 0.00390625, %v1062_v47  ;;  %v958_v61 = vpop.xlane.xlu1 %957  ;;  %v913_v49 = vpop.xlane.xlu0 %912 }
 0x195   : > { %1142 = vst.msk [vmem:[%s1658_s27 + $0x90] sm:$0xff] %vm204_vm2, %v1110_v1  ;;  %v1012_v50 = vadd.f32 %v958_v61, %v884_v45  ;;  %v997_v51 = vadd.f32 %v913_v49, %v869_v57  ;;  %v876_v1 = vld [vmem:[#allocation2 + $0x60] sm:$0xff]  ;;  %v891_v49 = vld [vmem:[#allocation2 + $0xd8] sm:$0xff] }
 0x196   : > { %1126 = vst.msk [vmem:[%s1658_s27 + $0x10] sm:$0xff] %vm204_vm2, %v1094_v48  ;;  %v1063_v52 = vld [vmem:[#allocation2 + $0x18] sm:$0xff] }
 0x197   : > { %v1095_v5 = vmul.f32 0.00390625, %v1063_v52  ;;  %1045 = vst.msk [vmem:[#allocation2 + $0xa0] sm:$0xff] %vm204_vm2, %v1012_v50  ;;  %1030 = vst.msk [vmem:[#allocation2 + $0x28] sm:$0xff] %vm204_vm2, %v997_v51 }
 0x198   : > { %v916_v6 = vpop.xlane.xlu1 %915  ;;  %v961_v7 = vpop.xlane.xlu0 %960 }
 0x199   : > { %1127 = vst.msk [vmem:[%s1658_s27 + $0x18] sm:$0xff] %vm204_vm2, %v1095_v5  ;;  %v998_v8 = vadd.f32 %v916_v6, %v870_v54  ;;  %v1013_v53 = vadd.f32 %v961_v7, %v885_v56  ;;  %v892_v6 = vld [vmem:[#allocation2 + $0xe0] sm:$0xff] }
 0x19a   : > { %v1064_v10 = vld [vmem:[#allocation2 + $0x20] sm:$0xff]  ;;  %v1079_v11 = vld [vmem:[#allocation2 + $0x98] sm:$0xff] }
 0x19b   : > { %v1096_v13 = vmul.f32 0.00390625, %v1064_v10  ;;  %v1111_v4 = vmul.f32 0.00390625, %v1079_v11  ;;  %1031 = vst.msk [vmem:[#allocation2 + $0x30] sm:$0xff] %vm204_vm2, %v998_v8  ;;  %1046 = vst.msk [vmem:[#allocation2 + $0xa8] sm:$0xff] %vm204_vm2, %v1013_v53  ;;  %v877_v53 = vld [vmem:[#allocation2 + $0x68] sm:$0xff] }
 0x19c   : > { %v964_v60 = vpop.xlane.xlu1 %963  ;;  %v919_v14 = vpop.xlane.xlu0 %918 }
 0x19d   : > { %1128 = vst.msk [vmem:[%s1658_s27 + $0x20] sm:$0xff] %vm204_vm2, %v1096_v13  ;;  %1143 = vst.msk [vmem:[%s1658_s27 + $0x98] sm:$0xff] %vm204_vm2, %v1111_v4  ;;  %v1014_v0 = vadd.f32 %v964_v60, %v886_v9  ;;  %v999_v15 = vadd.f32 %v919_v14, %v871_v12  ;;  %v878_v60 = vld [vmem:[#allocation2 + $0x70] sm:$0xff] }
 0x19e   : > { %v1080_v17 = vld [vmem:[#allocation2 + $0xa0] sm:$0xff]  ;;  %v1065_v18 = vld [vmem:[#allocation2 + $0x28] sm:$0xff] }
 0x19f   : > { %v1112_v55 = vmul.f32 0.00390625, %v1080_v17  ;;  %v1097_v19 = vmul.f32 0.00390625, %v1065_v18  ;;  %1047 = vst.msk [vmem:[#allocation2 + $0xb0] sm:$0xff] %vm204_vm2, %v1014_v0  ;;  %1032 = vst.msk [vmem:[#allocation2 + $0x38] sm:$0xff] %vm204_vm2, %v999_v15  ;;  %v893_v15 = vld [vmem:[#allocation2 + $0xe8] sm:$0xff] }
 0x1a0   : > { %v922_v20 = vpop.xlane.xlu1 %921  ;;  %v967_v21 = vpop.xlane.xlu0 %966 }
 0x1a1   : > { %1144 = vst.msk [vmem:[%s1658_s27 + $0xa0] sm:$0xff] %vm204_vm2, %v1112_v55  ;;  %1129 = vst.msk [vmem:[%s1658_s27 + $0x28] sm:$0xff] %vm204_vm2, %v1097_v19  ;;  %v1000_v22 = vadd.f32 %v922_v20, %v872_v16  ;;  %v1015_v59 = vadd.f32 %v967_v21, %v887_v3  ;;  %v894_v20 = vld [vmem:[#allocation2 + $0xf0] sm:$0xff] }
 0x1a2   : > { %v1066_v23 = vld [vmem:[#allocation2 + $0x30] sm:$0xff]  ;;  %v1081_v24 = vld [vmem:[#allocation2 + $0xa8] sm:$0xff] }
 0x1a3   : > { %v1098_v26 = vmul.f32 0.00390625, %v1066_v23  ;;  %v1113_v27 = vmul.f32 0.00390625, %v1081_v24  ;;  %1033 = vst.msk [vmem:[#allocation2 + $0x40] sm:$0xff] %vm204_vm2, %v1000_v22  ;;  %1048 = vst.msk [vmem:[#allocation2 + $0xb8] sm:$0xff] %vm204_vm2, %v1015_v59  ;;  %v879_v59 = vld [vmem:[#allocation2 + $0x78] sm:$0xff] }
 0x1a4   : > { %v970_v28 = vpop.xlane.xlu1 %969  ;;  %v925_v29 = vpop.xlane.xlu0 %924 }
 0x1a5   : > { %1130 = vst.msk [vmem:[%s1658_s27 + $0x30] sm:$0xff] %vm204_vm2, %v1098_v26  ;;  %1145 = vst.msk [vmem:[%s1658_s27 + $0xa8] sm:$0xff] %vm204_vm2, %v1113_v27  ;;  %v1016_v30 = vadd.f32 %v970_v28, %v888_v63  ;;  %v1001_v31 = vadd.f32 %v925_v29, %v873_v25 }
 0x1a6   : > { %v1082_v33 = vld [vmem:[#allocation2 + $0xb0] sm:$0xff]  ;;  %v1067_v34 = vld [vmem:[#allocation2 + $0x38] sm:$0xff] }
 0x1a7   : > { %v1114_v36 = vmul.f32 0.00390625, %v1082_v33  ;;  %v1099_v37 = vmul.f32 0.00390625, %v1067_v34  ;;  %1049 = vst.msk [vmem:[#allocation2 + $0xc0] sm:$0xff] %vm204_vm2, %v1016_v30  ;;  %1034 = vst.msk [vmem:[#allocation2 + $0x48] sm:$0xff] %vm204_vm2, %v1001_v31  ;;  %v895_v30 = vld [vmem:[#allocation2 + $0xf8] sm:$0xff] }
 0x1a8   : > { %v928_v58 = vpop.xlane.xlu1 %927  ;;  %v973_v38 = vpop.xlane.xlu0 %972 }
 0x1a9   : > { %1146 = vst.msk [vmem:[%s1658_s27 + $0xb0] sm:$0xff] %vm204_vm2, %v1114_v36  ;;  %1131 = vst.msk [vmem:[%s1658_s27 + $0x38] sm:$0xff] %vm204_vm2, %v1099_v37  ;;  %v1002_v39 = vadd.f32 %v928_v58, %v874_v32  ;;  %v1017_v2 = vadd.f32 %v973_v38, %v889_v35 }
 0x1aa   : > { %v1068_v40 = vld [vmem:[#allocation2 + $0x40] sm:$0xff]  ;;  %v1083_v41 = vld [vmem:[#allocation2 + $0xb8] sm:$0xff] }
 0x1ab   : > { %v1100_v43 = vmul.f32 0.00390625, %v1068_v40  ;;  %v1115_v44 = vmul.f32 0.00390625, %v1083_v41  ;;  %1035 = vst.msk [vmem:[#allocation2 + $0x50] sm:$0xff] %vm204_vm2, %v1002_v39  ;;  %1050 = vst.msk [vmem:[#allocation2 + $0xc8] sm:$0xff] %vm204_vm2, %v1017_v2 }
 0x1ac   : > { %v976_v45 = vpop.xlane.xlu1 %975  ;;  %v931_v46 = vpop.xlane.xlu0 %930 }
 0x1ad   : > { %1132 = vst.msk [vmem:[%s1658_s27 + $0x40] sm:$0xff] %vm204_vm2, %v1100_v43  ;;  %1147 = vst.msk [vmem:[%s1658_s27 + $0xb8] sm:$0xff] %vm204_vm2, %v1115_v44  ;;  %v1018_v47 = vadd.f32 %v976_v45, %v890_v62  ;;  %v1003_v57 = vadd.f32 %v931_v46, %v875_v42 }
 0x1ae   : > { %v1084_v48 = vld [vmem:[#allocation2 + $0xc0] sm:$0xff]  ;;  %v1069_v61 = vld [vmem:[#allocation2 + $0x48] sm:$0xff] }
 0x1af   : > { %v1116_v50 = vmul.f32 0.00390625, %v1084_v48  ;;  %v1101_v51 = vmul.f32 0.00390625, %v1069_v61  ;;  %1051 = vst.msk [vmem:[#allocation2 + $0xd0] sm:$0xff] %vm204_vm2, %v1018_v47  ;;  %1036 = vst.msk [vmem:[#allocation2 + $0x58] sm:$0xff] %vm204_vm2, %v1003_v57 }
 0x1b0   : > { %v934_v52 = vpop.xlane.xlu1 %933  ;;  %v979_v54 = vpop.xlane.xlu0 %978 }
 0x1b1   : > { %1148 = vst.msk [vmem:[%s1658_s27 + $0xc0] sm:$0xff] %vm204_vm2, %v1116_v50  ;;  %1133 = vst.msk [vmem:[%s1658_s27 + $0x48] sm:$0xff] %vm204_vm2, %v1101_v51  ;;  %v1004_v56 = vadd.f32 %v934_v52, %v876_v1  ;;  %v1019_v5 = vadd.f32 %v979_v54, %v891_v49 }
 0x1b2   : > { %v1070_v7 = vld [vmem:[#allocation2 + $0x50] sm:$0xff]  ;;  %v1085_v8 = vld [vmem:[#allocation2 + $0xc8] sm:$0xff] }
 0x1b3   : > { %v1102_v9 = vmul.f32 0.00390625, %v1070_v7  ;;  %v1117_v10 = vmul.f32 0.00390625, %v1085_v8  ;;  %1037 = vst.msk [vmem:[#allocation2 + $0x60] sm:$0xff] %vm204_vm2, %v1004_v56  ;;  %1052 = vst.msk [vmem:[#allocation2 + $0xd8] sm:$0xff] %vm204_vm2, %v1019_v5 }
 0x1b4   : > { %v982_v11 = vpop.xlane.xlu1 %981  ;;  %v937_v12 = vpop.xlane.xlu0 %936 }
 0x1b5   : > { %1134 = vst.msk [vmem:[%s1658_s27 + $0x50] sm:$0xff] %vm204_vm2, %v1102_v9  ;;  %1149 = vst.msk [vmem:[%s1658_s27 + $0xc8] sm:$0xff] %vm204_vm2, %v1117_v10  ;;  %v1020_v13 = vadd.f32 %v982_v11, %v892_v6  ;;  %v1005_v4 = vadd.f32 %v937_v12, %v877_v53 }
 0x1b6   : > { %v1086_v14 = vld [vmem:[#allocation2 + $0xd0] sm:$0xff]  ;;  %v1071_v0 = vld [vmem:[#allocation2 + $0x58] sm:$0xff] }
 0x1b7   : > { %v1118_v16 = vmul.f32 0.00390625, %v1086_v14  ;;  %v1103_v17 = vmul.f32 0.00390625, %v1071_v0  ;;  %1053 = vst.msk [vmem:[#allocation2 + $0xe0] sm:$0xff] %vm204_vm2, %v1020_v13  ;;  %1038 = vst.msk [vmem:[#allocation2 + $0x68] sm:$0xff] %vm204_vm2, %v1005_v4 }
 0x1b8   : > { %v940_v18 = vpop.xlane.xlu1 %939  ;;  %v985_v3 = vpop.xlane.xlu0 %984 }
 0x1b9   : > { %1150 = vst.msk [vmem:[%s1658_s27 + $0xd0] sm:$0xff] %vm204_vm2, %v1118_v16  ;;  %1135 = vst.msk [vmem:[%s1658_s27 + $0x58] sm:$0xff] %vm204_vm2, %v1103_v17  ;;  %v1006_v55 = vadd.f32 %v940_v18, %v878_v60  ;;  %v1021_v19 = vadd.f32 %v985_v3, %v893_v15 }
 0x1ba   : > { %v1072_v21 = vld [vmem:[#allocation2 + $0x60] sm:$0xff]  ;;  %v1087_v22 = vld [vmem:[#allocation2 + $0xd8] sm:$0xff] }
 0x1bb   : > { %v1104_v63 = vmul.f32 0.00390625, %v1072_v21  ;;  %v1119_v23 = vmul.f32 0.00390625, %v1087_v22  ;;  %1039 = vst.msk [vmem:[#allocation2 + $0x70] sm:$0xff] %vm204_vm2, %v1006_v55  ;;  %1054 = vst.msk [vmem:[#allocation2 + $0xe8] sm:$0xff] %vm204_vm2, %v1021_v19 }
 0x1bc   : > { %v988_v24 = vpop.xlane.xlu1 %987  ;;  %v943_v25 = vpop.xlane.xlu0 %942 }
 0x1bd   : > { %1136 = vst.msk [vmem:[%s1658_s27 + $0x60] sm:$0xff] %vm204_vm2, %v1104_v63  ;;  %1151 = vst.msk [vmem:[%s1658_s27 + $0xd8] sm:$0xff] %vm204_vm2, %v1119_v23  ;;  %v1022_v26 = vadd.f32 %v988_v24, %v894_v20  ;;  %v1007_v27 = vadd.f32 %v943_v25, %v879_v59 }
 0x1be   : > { %v1088_v28 = vld [vmem:[#allocation2 + $0xe0] sm:$0xff]  ;;  %v1073_v29 = vld [vmem:[#allocation2 + $0x68] sm:$0xff] }
 0x1bf   : > { %v1120_v31 = vmul.f32 0.00390625, %v1088_v28  ;;  %v1105_v32 = vmul.f32 0.00390625, %v1073_v29  ;;  %1055 = vst.msk [vmem:[#allocation2 + $0xf0] sm:$0xff] %vm204_vm2, %v1022_v26  ;;  %1040 = vst.msk [vmem:[#allocation2 + $0x78] sm:$0xff] %vm204_vm2, %v1007_v27 }
 0x1c0   : > { %v991_v33 = vpop.xlane.xlu0 %990 }
 0x1c1   : > { %1152 = vst.msk [vmem:[%s1658_s27 + $0xe0] sm:$0xff] %vm204_vm2, %v1120_v31  ;;  %1137 = vst.msk [vmem:[%s1658_s27 + $0x68] sm:$0xff] %vm204_vm2, %v1105_v32  ;;  %v1023_v34 = vadd.f32 %v991_v33, %v895_v30 }
 0x1c2   : > { %v1074_v35 = vld [vmem:[#allocation2 + $0x70] sm:$0xff]  ;;  %v1089_v36 = vld [vmem:[#allocation2 + $0xe8] sm:$0xff] }
 0x1c3   : > { %v1106_v37 = vmul.f32 0.00390625, %v1074_v35  ;;  %v1121_v58 = vmul.f32 0.00390625, %v1089_v36  ;;  %1056 = vst.msk [vmem:[#allocation2 + $0xf8] sm:$0xff] %vm204_vm2, %v1023_v34 }
 0x1c5   : > { %1138 = vst.msk [vmem:[%s1658_s27 + $0x70] sm:$0xff] %vm204_vm2, %v1106_v37  ;;  %1153 = vst.msk [vmem:[%s1658_s27 + $0xe8] sm:$0xff] %vm204_vm2, %v1121_v58 }
 0x1c6   : > { %v1090_v38 = vld [vmem:[#allocation2 + $0xf0] sm:$0xff]  ;;  %v1075_v39 = vld [vmem:[#allocation2 + $0x78] sm:$0xff] }
 0x1c7   : > { %v1122_v2 = vmul.f32 0.00390625, %v1090_v38  ;;  %v1107_v62 = vmul.f32 0.00390625, %v1075_v39 }
 0x1c9   : > { %1154 = vst.msk [vmem:[%s1658_s27 + $0xf0] sm:$0xff] %vm204_vm2, %v1122_v2  ;;  %1139 = vst.msk [vmem:[%s1658_s27 + $0x78] sm:$0xff] %vm204_vm2, %v1107_v62 }
 0x1ca   : > { %v1091_v40 = vld [vmem:[#allocation2 + $0xf8] sm:$0xff] }
 0x1cb   : > { %v1123_v41 = vmul.f32 0.00390625, %v1091_v40 }
 0x1cd   : > { %1155 = vst.msk [vmem:[%s1658_s27 + $0xf8] sm:$0xff] %vm204_vm2, %v1123_v41 }
 0x1ce PF: > { %s13_s14 = sadd.s32 1, %s1340_s14   ;;  %s1765_s12 = smov %s1336_s13 }
 0x1cf   : > { %p10_p5 = scmp.ge.s32.totalorder %s13_s14, 4   ;;  %s1766_s13 = smov %s1768_s15 }
 0x1d1   :  { %12 = sbr.rel (!%p10_p5) target bundleno = 2 (0x2), region = 70 }

</bundles_post_ra>
